<compile_context>
chip_gen: v7x
topology: tpu7x:2x2x1
jax: 0.10.0
libtpu: 0.0.40
codegen_flags: <defaults>
</compile_context>

<pallas_src>
import functools

import jax
import jax.numpy as jnp
from jax import lax
from jax.experimental import pallas as pl
from jax.experimental.pallas import tpu as pltpu


# ---------------------------------------------------------------------------
# Weight preparation (wrapper-side, tiny, runs once per call under jit)
# ---------------------------------------------------------------------------
def _banded_weights(w, W):
    """(3, 3, Cin, Cout) conv taps -> per-ky block-banded matmul weights (W-halo folded in).

    m[ky, win*Cin + ci, wout*Cout + co] = w[ky, kx, ci, co]  with  win = wout + kx - 1.
    Out-of-range taps simply have no entry (== zero padding), so the kernel never builds
    a lane-axis halo; one matmul (M, W*Cin) @ (W*Cin, W*Cout) applies a whole kernel row.
    """
    cin, cout = w.shape[2], w.shape[3]
    # shift[kx, win, wout] = 1  iff  win == wout + kx - 1  (taps outside [0, W) clip to 0)
    shift = jnp.stack([jnp.eye(W, W, k=1 - kx, dtype=w.dtype) for kx in range(3)])
    m = jnp.einsum("xpw,yxio->ypiwo", shift, w)          # (3, W, Cin, W, Cout)
    return m.reshape(3, W * cin, W * cout)


# ---------------------------------------------------------------------------
# Fused kernel: (conv3x3 -> BN(train) -> ReLU) x 2, all N images in one block
# ---------------------------------------------------------------------------
def _basic_block_kernel(xp_ref, m1_ref, m2_ref, g1_ref, be1_ref, g2_ref, be2_ref,
                        p_ref, pt_ref, o_ref, *, N, H, W, C, eps, mxu_dtype):
    Hp = H + 2
    M = N * Hp - 2                      # conv output rows (valid + 2*(N-1) junk separators)
    cnt = jnp.float32(N * H * W)        # BN normalizes over the whole batch x H x W

    # Row r of the stacked conv output belongs to image n = r // (H+2) at height
    # h = r % (H+2); rows with h >= H are junk separator rows between images.
    rows = lax.broadcasted_iota(jnp.int32, (M, 1), 0)
    valid = (rows % Hp) < H

    fold = p_ref[...]                   # (W*C, C)  sum across the W fold (per channel)
    unfold = pt_ref[...]                # (C, W*C)  broadcast per-channel back across the fold

    def conv_bn_relu(xp, m_ref, g_ref, be_ref):
        # --- 3x3 conv: 3 fat banded matmuls, batched over all N images (M rows each).
        acc = jnp.zeros((M, W * C), jnp.float32)
        for ky in range(3):
            acc = acc + jnp.dot(xp[ky:ky + M, :].astype(mxu_dtype), m_ref[ky],
                                preferred_element_type=jnp.float32)
        # --- train-mode BN: mean first, then centered variance (no E[x^2]-E[x]^2
        #     cancellation); fold-reduction via tiny 0/1 matmuls, all in VMEM.
        accv = jnp.where(valid, acc, 0.0)
        mean = jnp.dot(jnp.sum(accv, axis=0, keepdims=True), fold,
                       preferred_element_type=jnp.float32) / cnt        # (1, C)
        mean_f = jnp.dot(mean, unfold, preferred_element_type=jnp.float32)
        d = jnp.where(valid, acc - mean_f, 0.0)
        var = jnp.dot(jnp.sum(d * d, axis=0, keepdims=True), fold,
                      preferred_element_type=jnp.float32) / cnt          # (1, C)
        scale = g_ref[...] * lax.rsqrt(var + eps)                        # (1, C)
        shift = be_ref[...] - mean * scale
        scale_f = jnp.dot(scale, unfold, preferred_element_type=jnp.float32)
        shift_f = jnp.dot(shift, unfold, preferred_element_type=jnp.float32)
        y = jnp.maximum(acc * scale_f + shift_f, 0.0)
        return jnp.where(valid, y, 0.0)         # zero junk rows (they feed stage 2's halo)

    # stage 1: input slab already padded/stacked by the wrapper: (N*(H+2), W*Cin)
    y1 = conv_bn_relu(xp_ref[...].astype(jnp.float32), m1_ref, g1_ref, be1_ref)

    # stage 2: shifting the stage-1 rows down by one (zero rows at both ends) reproduces
    # exactly the per-image [zero; image; zero] H-halo layout the banded conv expects.
    zrow = jnp.zeros((1, W * C), jnp.float32)
    xp2 = jnp.concatenate([zrow, y1, zrow], axis=0)          # (N*(H+2), W*C)
    y2 = conv_bn_relu(xp2, m2_ref, g2_ref, be2_ref)

    # lane-dense (H, W*C) store per image (static loop; N is small)
    for n in range(N):
        o_ref[n] = y2[n * Hp:n * Hp + H, :].astype(o_ref.dtype)


# ---------------------------------------------------------------------------
# BasicBlock forward + params
# ---------------------------------------------------------------------------
def basic_block_forward(x_nchw, params, *, mxu_dtype=jnp.float32, eps=1e-5):
    """BasicBlock.forward: (conv3x3 -> BatchNorm2d(train) -> ReLU) x 2.  NCHW in / out.

    mxu_dtype=jnp.bfloat16 feeds the MXU bf16 operands (f32 accumulation) — the native
    path on v6e/v7x; default f32 preserves the module's f32 numerics.
    """
    N, Cin, H, W = x_nchw.shape
    C = params["w1"].shape[-1]
    assert params["w2"].shape[-1] == C and params["w2"].shape[-2] == C

    # NCHW -> folded NHWC with channels fastest on the lane axis; pad each image with one
    # zero row above/below and stack, giving the (N*(H+2), W*Cin) matmul slab.
    x = jnp.transpose(x_nchw, (0, 2, 3, 1))                               # (N, H, W, Cin)
    xp = jnp.pad(x, ((0, 0), (1, 1), (0, 0), (0, 0))).reshape(N * (H + 2), W * Cin)

    m1 = _banded_weights(params["w1"], W).astype(mxu_dtype)               # (3, W*Cin, W*C)
    m2 = _banded_weights(params["w2"], W).astype(mxu_dtype)               # (3, W*C,   W*C)

    # fold / unfold matrices for the per-channel BN reduction across the W fold
    p = jnp.tile(jnp.eye(C, dtype=jnp.float32), (W, 1))                   # (W*C, C)
    pt = jnp.transpose(p)                                                  # (C, W*C)

    g1 = params["g1"].reshape(1, C).astype(jnp.float32)
    be1 = params["be1"].reshape(1, C).astype(jnp.float32)
    g2 = params["g2"].reshape(1, C).astype(jnp.float32)
    be2 = params["be2"].reshape(1, C).astype(jnp.float32)

    args = (xp, m1, m2, g1, be1, g2, be2, p, pt)

    def im2(i):
        return (0, 0)

    def im3(i):
        return (0, 0, 0)

    in_specs = [
        pl.BlockSpec(xp.shape, im2),
        pl.BlockSpec(m1.shape, im3),
        pl.BlockSpec(m2.shape, im3),
        pl.BlockSpec(g1.shape, im2), pl.BlockSpec(be1.shape, im2),
        pl.BlockSpec(g2.shape, im2), pl.BlockSpec(be2.shape, im2),
        pl.BlockSpec(p.shape, im2), pl.BlockSpec(pt.shape, im2),
    ]

    Mrows = N * (H + 2) - 2
    flops = 2 * 3 * Mrows * (W * Cin) * (W * C) + 2 * 3 * Mrows * (W * C) * (W * C)
    bytes_in = sum(a.size * a.dtype.itemsize for a in args)
    bytes_out = N * H * W * C * x_nchw.dtype.itemsize
    # Everything (input slab, both band matrices, intermediates, output) lives in VMEM for
    # the single grid step; budget clamped well below v7x's 64 MiB physical VMEM per TC.
    vmem_budget = int(min(max(4 * (bytes_in + bytes_out) + (2 << 20), 4 << 20), 48 << 20))

    out = pl.pallas_call(
        functools.partial(_basic_block_kernel, N=N, H=H, W=W, C=C,
                          eps=eps, mxu_dtype=mxu_dtype),
        grid=(1,),
        in_specs=in_specs,
        out_specs=pl.BlockSpec((N, H, W * C), im3),
        out_shape=jax.ShapeDtypeStruct((N, H, W * C), x_nchw.dtype),
        compiler_params=pltpu.CompilerParams(
            dimension_semantics=("arbitrary",), vmem_limit_bytes=vmem_budget),
        cost_estimate=pl.CostEstimate(flops=flops, transcendentals=2 * C,
                                      bytes_accessed=bytes_in + bytes_out),
    )(*args)

    return jnp.transpose(out.reshape(N, H, W, C), (0, 3, 1, 2))


def init_params(key, in_channels, out_channels):
    """Synthetic parameters, shapes matching nn.Conv2d / nn.BatchNorm2d."""
    k1, k2, k3, k4 = jax.random.split(key, 4)
    # conv weights stored as (kh, kw, Cin, Cout)  (== torch (Cout,Cin,kh,kw) permuted)
    w1 = 0.1 * jax.random.normal(k1, (3, 3, in_channels, out_channels), jnp.float32)
    w2 = 0.1 * jax.random.normal(k3, (3, 3, out_channels, out_channels), jnp.float32)
    # Conv biases exist in the torch module but are cancelled exactly by train-mode BN's
    # mean subtraction, so the kernel never reads them (kept only for interface parity).
    b1 = 0.1 * jax.random.normal(k2, (out_channels,), jnp.float32)
    b2 = 0.1 * jax.random.normal(k4, (out_channels,), jnp.float32)
    g1 = jnp.ones((out_channels,), jnp.float32)
    be1 = jnp.zeros((out_channels,), jnp.float32)
    g2 = jnp.ones((out_channels,), jnp.float32)
    be2 = jnp.zeros((out_channels,), jnp.float32)
    return dict(w1=w1, b1=b1, g1=g1, be1=be1, w2=w2, b2=b2, g2=g2, be2=be2)


# ---------------------------------------------------------------------------
# Pure-XLA reference (loose numerical cross-check)
# ---------------------------------------------------------------------------
def _reference_forward(x_nchw, params):
    def stage(x, w, g, be):
        wt = jnp.transpose(w, (3, 2, 0, 1))                       # (Cout, Cin, kh, kw)
        y = jax.lax.conv_general_dilated(
            x, wt, window_strides=(1, 1), padding=((1, 1), (1, 1)),
            dimension_numbers=("NCHW", "OIHW", "NCHW"),
            precision=jax.lax.Precision.HIGHEST)
        # (conv bias omitted: cancelled exactly by the train-mode BN below)
        mean = jnp.mean(y, axis=(0, 2, 3), keepdims=True)
        var = jnp.mean((y - mean) ** 2, axis=(0, 2, 3), keepdims=True)
        y = (y - mean) * jax.lax.rsqrt(var + 1e-5)
        y = y * g.reshape(1, -1, 1, 1) + be.reshape(1, -1, 1, 1)
        return jnp.maximum(y, 0.0)

    x = stage(x_nchw, params["w1"], params["g1"], params["be1"])
    return stage(x, params["w2"], params["g2"], params["be2"])


if __name__ == "__main__":
    key = jax.random.PRNGKey(0)
    kx, kp = jax.random.split(key)

    N, Cin, H, W = 2, 4, 16, 16
    Cout = 8

    x = jax.random.normal(kx, (N, Cin, H, W), jnp.float32)        # NCHW, like PyTorch
    params = init_params(kp, Cin, Cout)

    # f32 MXU path (default): matches the module's f32 numerics closely.
    out = jax.block_until_ready(jax.jit(basic_block_forward)(x, params))
    assert out.shape == (N, Cout, H, W), out.shape
    assert bool(jnp.all(out >= 0.0))                  # ReLU output is non-negative
    assert bool(jnp.all(jnp.isfinite(out)))

    ref = _reference_forward(x, params)
    max_err = float(jnp.max(jnp.abs(out - ref)))
    assert max_err < 3e-2, max_err

    # v6e/v7x-native MXU feed: bf16 operands, f32 accumulation (looser tolerance).
    fwd_bf16 = jax.jit(lambda xx, pp: basic_block_forward(xx, pp, mxu_dtype=jnp.bfloat16))
    out_bf16 = jax.block_until_ready(fwd_bf16(x, params))
    assert bool(jnp.all(jnp.isfinite(out_bf16)))
    max_err_bf16 = float(jnp.max(jnp.abs(out_bf16 - ref)))
    assert max_err_bf16 < 1.5e-1, max_err_bf16

    print("KERNEL_OK")
</pallas_src>

<mosaic_0001>
module attributes {stable_mosaic.version = 11 : i64} {
  func.func @_basic_block_kernel(%arg0: i32, %arg1: memref<36x64xf32, #tpu.memory_space<vmem>>, %arg2: memref<3x64x128xf32, #tpu.memory_space<vmem>>, %arg3: memref<3x128x128xf32, #tpu.memory_space<vmem>>, %arg4: memref<1x8xf32, #tpu.memory_space<vmem>>, %arg5: memref<1x8xf32, #tpu.memory_space<vmem>>, %arg6: memref<1x8xf32, #tpu.memory_space<vmem>>, %arg7: memref<1x8xf32, #tpu.memory_space<vmem>>, %arg8: memref<128x8xf32, #tpu.memory_space<vmem>>, %arg9: memref<8x128xf32, #tpu.memory_space<vmem>>, %arg10: memref<2x16x128xf32, #tpu.memory_space<vmem>>) attributes {dimension_semantics = [#tpu.dimension_semantics<arbitrary>], iteration_bounds = array<i64: 1>, scalar_prefetch = 0 : i64, scratch_operands = 0 : i64, tpu.core_type = #tpu.core_type<tc>, window_params = [{pipeline_mode = #tpu.pipeline_mode<synchronous>, transform_indices = @transform_0, window_bounds = array<i64: 36, 64>}, {pipeline_mode = #tpu.pipeline_mode<synchronous>, transform_indices = @transform_1, window_bounds = array<i64: 3, 64, 128>}, {pipeline_mode = #tpu.pipeline_mode<synchronous>, transform_indices = @transform_2, window_bounds = array<i64: 3, 128, 128>}, {pipeline_mode = #tpu.pipeline_mode<synchronous>, transform_indices = @transform_3, window_bounds = array<i64: 1, 8>}, {pipeline_mode = #tpu.pipeline_mode<synchronous>, transform_indices = @transform_4, window_bounds = array<i64: 1, 8>}, {pipeline_mode = #tpu.pipeline_mode<synchronous>, transform_indices = @transform_5, window_bounds = array<i64: 1, 8>}, {pipeline_mode = #tpu.pipeline_mode<synchronous>, transform_indices = @transform_6, window_bounds = array<i64: 1, 8>}, {pipeline_mode = #tpu.pipeline_mode<synchronous>, transform_indices = @transform_7, window_bounds = array<i64: 128, 8>}, {pipeline_mode = #tpu.pipeline_mode<synchronous>, transform_indices = @transform_8, window_bounds = array<i64: 8, 128>}, {pipeline_mode = #tpu.pipeline_mode<synchronous>, transform_indices = @transform_9, window_bounds = array<i64: 2, 16, 128>}]} {
    %0 = tpu.iota {dimensions = array<i32: 0>} : vector<34x1xi32>
    %c18_i32 = arith.constant 18 : i32
    %c0_i32 = arith.constant 0 : i32
    %1 = arith.cmpi eq, %c18_i32, %c0_i32 : i32
    %c1_i32 = arith.constant 1 : i32
    %2 = arith.select %1, %c1_i32, %c18_i32 : i32
    %3 = vector.broadcast %2 : i32 to vector<34x1xi32>
    %4 = arith.remsi %0, %3 : vector<34x1xi32>
    %c0_i32_0 = arith.constant 0 : i32
    %5 = vector.broadcast %c0_i32_0 : i32 to vector<34x1xi32>
    %6 = arith.cmpi ne, %4, %5 : vector<34x1xi32>
    %c0_i32_1 = arith.constant 0 : i32
    %7 = vector.broadcast %c0_i32_1 : i32 to vector<34x1xi32>
    %8 = arith.cmpi slt, %4, %7 : vector<34x1xi32>
    %c0_i32_2 = arith.constant 0 : i32
    %9 = arith.cmpi slt, %2, %c0_i32_2 : i32
    %10 = vector.broadcast %9 : i1 to vector<34x1xi1>
    %11 = vector.broadcast %10 : vector<34x1xi1> to vector<34x1xi1>
    %12 = arith.xori %8, %11 : vector<34x1xi1>
    %13 = arith.andi %12, %6 : vector<34x1xi1>
    %14 = vector.broadcast %2 : i32 to vector<34x1xi32>
    %15 = arith.addi %4, %14 : vector<34x1xi32>
    %16 = arith.select %13, %15, %4 : vector<34x1xi1>, vector<34x1xi32>
    %c16_i32 = arith.constant 16 : i32
    %17 = vector.broadcast %c16_i32 : i32 to vector<34x1xi32>
    %18 = arith.cmpi slt, %16, %17 : vector<34x1xi32>
    %c0 = arith.constant 0 : index
    %c0_3 = arith.constant 0 : index
    %19 = vector.load %arg8[%c0, %c0_3] : memref<128x8xf32, #tpu.memory_space<vmem>>, vector<128x8xf32>
    %c0_4 = arith.constant 0 : index
    %c0_5 = arith.constant 0 : index
    %20 = vector.load %arg9[%c0_4, %c0_5] : memref<8x128xf32, #tpu.memory_space<vmem>>, vector<8x128xf32>
    %c0_6 = arith.constant 0 : index
    %c0_7 = arith.constant 0 : index
    %21 = vector.load %arg1[%c0_6, %c0_7] : memref<36x64xf32, #tpu.memory_space<vmem>>, vector<36x64xf32>
    %cst = arith.constant 0.000000e+00 : f32
    %22 = vector.broadcast %cst : f32 to vector<34x128xf32>
    %23 = vector.extract_strided_slice %21 {offsets = [0, 0], sizes = [34, 64], strides = [1, 1]} : vector<36x64xf32> to vector<34x64xf32>
    %c0_8 = arith.constant 0 : index
    %c0_9 = arith.constant 0 : index
    %c0_10 = arith.constant 0 : index
    %24 = vector.load %arg2[%c0_8, %c0_9, %c0_10] : memref<3x64x128xf32, #tpu.memory_space<vmem>>, vector<1x64x128xf32>
    %25 = vector.shape_cast %24 : vector<1x64x128xf32> to vector<64x128xf32>
    %cst_11 = arith.constant dense<0.000000e+00> : vector<34x128xf32>
    %26 = tpu.matmul %23, %25, %cst_11 {dimension_numbers = #tpu.dot_dimension_numbers<[1], [0], [0], [1], [0, 0, 1, 1], [], []>} : vector<34x64xf32>, vector<64x128xf32>, vector<34x128xf32> -> vector<34x128xf32>
    %27 = arith.addf %22, %26 : vector<34x128xf32>
    %28 = vector.extract_strided_slice %21 {offsets = [1, 0], sizes = [34, 64], strides = [1, 1]} : vector<36x64xf32> to vector<34x64xf32>
    %c1 = arith.constant 1 : index
    %c0_12 = arith.constant 0 : index
    %c0_13 = arith.constant 0 : index
    %29 = vector.load %arg2[%c1, %c0_12, %c0_13] : memref<3x64x128xf32, #tpu.memory_space<vmem>>, vector<1x64x128xf32>
    %30 = vector.shape_cast %29 : vector<1x64x128xf32> to vector<64x128xf32>
    %cst_14 = arith.constant dense<0.000000e+00> : vector<34x128xf32>
    %31 = tpu.matmul %28, %30, %cst_14 {dimension_numbers = #tpu.dot_dimension_numbers<[1], [0], [0], [1], [0, 0, 1, 1], [], []>} : vector<34x64xf32>, vector<64x128xf32>, vector<34x128xf32> -> vector<34x128xf32>
    %32 = arith.addf %27, %31 : vector<34x128xf32>
    %33 = vector.extract_strided_slice %21 {offsets = [2, 0], sizes = [34, 64], strides = [1, 1]} : vector<36x64xf32> to vector<34x64xf32>
    %c2 = arith.constant 2 : index
    %c0_15 = arith.constant 0 : index
    %c0_16 = arith.constant 0 : index
    %34 = vector.load %arg2[%c2, %c0_15, %c0_16] : memref<3x64x128xf32, #tpu.memory_space<vmem>>, vector<1x64x128xf32>
    %35 = vector.shape_cast %34 : vector<1x64x128xf32> to vector<64x128xf32>
    %cst_17 = arith.constant dense<0.000000e+00> : vector<34x128xf32>
    %36 = tpu.matmul %33, %35, %cst_17 {dimension_numbers = #tpu.dot_dimension_numbers<[1], [0], [0], [1], [0, 0, 1, 1], [], []>} : vector<34x64xf32>, vector<64x128xf32>, vector<34x128xf32> -> vector<34x128xf32>
    %37 = arith.addf %32, %36 : vector<34x128xf32>
    %cst_18 = arith.constant 0.000000e+00 : f32
    %38 = vector.shape_cast %18 : vector<34x1xi1> to vector<34x1xi1>
    %39 = vector.broadcast %38 : vector<34x1xi1> to vector<34x128xi1>
    %40 = vector.broadcast %cst_18 : f32 to vector<34x128xf32>
    %41 = arith.select %39, %37, %40 : vector<34x128xi1>, vector<34x128xf32>
    %cst_19 = arith.constant dense<0.000000e+00> : vector<128xf32>
    %42 = vector.multi_reduction <add>, %41, %cst_19 [0] : vector<34x128xf32> to vector<128xf32>
    %43 = vector.shape_cast %42 : vector<128xf32> to vector<1x128xf32>
    %cst_20 = arith.constant dense<0.000000e+00> : vector<1x8xf32>
    %44 = tpu.matmul %43, %19, %cst_20 {dimension_numbers = #tpu.dot_dimension_numbers<[1], [0], [0], [1], [0, 0, 1, 1], [], []>} : vector<1x128xf32>, vector<128x8xf32>, vector<1x8xf32> -> vector<1x8xf32>
    %cst_21 = arith.constant 5.120000e+02 : f32
    %45 = vector.broadcast %cst_21 : f32 to vector<1x8xf32>
    %46 = arith.divf %44, %45 : vector<1x8xf32>
    %cst_22 = arith.constant dense<0.000000e+00> : vector<1x128xf32>
    %47 = tpu.matmul %46, %20, %cst_22 {dimension_numbers = #tpu.dot_dimension_numbers<[1], [0], [0], [1], [0, 0, 1, 1], [], []>} : vector<1x8xf32>, vector<8x128xf32>, vector<1x128xf32> -> vector<1x128xf32>
    %48 = vector.broadcast %47 : vector<1x128xf32> to vector<34x128xf32>
    %49 = arith.subf %37, %48 : vector<34x128xf32>
    %cst_23 = arith.constant 0.000000e+00 : f32
    %50 = vector.shape_cast %18 : vector<34x1xi1> to vector<34x1xi1>
    %51 = vector.broadcast %50 : vector<34x1xi1> to vector<34x128xi1>
    %52 = vector.broadcast %cst_23 : f32 to vector<34x128xf32>
    %53 = arith.select %51, %49, %52 : vector<34x128xi1>, vector<34x128xf32>
    %54 = arith.mulf %53, %53 : vector<34x128xf32>
    %cst_24 = arith.constant dense<0.000000e+00> : vector<128xf32>
    %55 = vector.multi_reduction <add>, %54, %cst_24 [0] : vector<34x128xf32> to vector<128xf32>
    %56 = vector.shape_cast %55 : vector<128xf32> to vector<1x128xf32>
    %cst_25 = arith.constant dense<0.000000e+00> : vector<1x8xf32>
    %57 = tpu.matmul %56, %19, %cst_25 {dimension_numbers = #tpu.dot_dimension_numbers<[1], [0], [0], [1], [0, 0, 1, 1], [], []>} : vector<1x128xf32>, vector<128x8xf32>, vector<1x8xf32> -> vector<1x8xf32>
    %cst_26 = arith.constant 5.120000e+02 : f32
    %58 = vector.broadcast %cst_26 : f32 to vector<1x8xf32>
    %59 = arith.divf %57, %58 : vector<1x8xf32>
    %c0_27 = arith.constant 0 : index
    %c0_28 = arith.constant 0 : index
    %60 = vector.load %arg4[%c0_27, %c0_28] : memref<1x8xf32, #tpu.memory_space<vmem>>, vector<1x8xf32>
    %cst_29 = arith.constant 9.99999974E-6 : f32
    %61 = vector.broadcast %cst_29 : f32 to vector<1x8xf32>
    %62 = arith.addf %59, %61 : vector<1x8xf32>
    %63 = math.rsqrt %62 : vector<1x8xf32>
    %64 = arith.mulf %60, %63 : vector<1x8xf32>
    %c0_30 = arith.constant 0 : index
    %c0_31 = arith.constant 0 : index
    %65 = vector.load %arg5[%c0_30, %c0_31] : memref<1x8xf32, #tpu.memory_space<vmem>>, vector<1x8xf32>
    %66 = arith.mulf %46, %64 : vector<1x8xf32>
    %67 = arith.subf %65, %66 : vector<1x8xf32>
    %cst_32 = arith.constant dense<0.000000e+00> : vector<1x128xf32>
    %68 = tpu.matmul %64, %20, %cst_32 {dimension_numbers = #tpu.dot_dimension_numbers<[1], [0], [0], [1], [0, 0, 1, 1], [], []>} : vector<1x8xf32>, vector<8x128xf32>, vector<1x128xf32> -> vector<1x128xf32>
    %cst_33 = arith.constant dense<0.000000e+00> : vector<1x128xf32>
    %69 = tpu.matmul %67, %20, %cst_33 {dimension_numbers = #tpu.dot_dimension_numbers<[1], [0], [0], [1], [0, 0, 1, 1], [], []>} : vector<1x8xf32>, vector<8x128xf32>, vector<1x128xf32> -> vector<1x128xf32>
    %70 = vector.broadcast %68 : vector<1x128xf32> to vector<34x128xf32>
    %71 = arith.mulf %37, %70 : vector<34x128xf32>
    %72 = vector.broadcast %69 : vector<1x128xf32> to vector<34x128xf32>
    %73 = arith.addf %71, %72 : vector<34x128xf32>
    %cst_34 = arith.constant 0.000000e+00 : f32
    %74 = vector.broadcast %cst_34 : f32 to vector<34x128xf32>
    %75 = arith.maximumf %73, %74 : vector<34x128xf32>
    %cst_35 = arith.constant 0.000000e+00 : f32
    %76 = vector.shape_cast %18 : vector<34x1xi1> to vector<34x1xi1>
    %77 = vector.broadcast %76 : vector<34x1xi1> to vector<34x128xi1>
    %78 = vector.broadcast %cst_35 : f32 to vector<34x128xf32>
    %79 = arith.select %77, %75, %78 : vector<34x128xi1>, vector<34x128xf32>
    %cst_36 = arith.constant 0.000000e+00 : f32
    %80 = vector.broadcast %cst_36 : f32 to vector<1x128xf32>
    %81 = tpu.concatenate %80, %79, %80 in 0 : vector<1x128xf32>, vector<34x128xf32>, vector<1x128xf32> -> vector<36x128xf32>
    %cst_37 = arith.constant 0.000000e+00 : f32
    %82 = vector.broadcast %cst_37 : f32 to vector<34x128xf32>
    %83 = vector.extract_strided_slice %81 {offsets = [0, 0], sizes = [34, 128], strides = [1, 1]} : vector<36x128xf32> to vector<34x128xf32>
    %c0_38 = arith.constant 0 : index
    %c0_39 = arith.constant 0 : index
    %c0_40 = arith.constant 0 : index
    %84 = vector.load %arg3[%c0_38, %c0_39, %c0_40] : memref<3x128x128xf32, #tpu.memory_space<vmem>>, vector<1x128x128xf32>
    %85 = vector.shape_cast %84 : vector<1x128x128xf32> to vector<128x128xf32>
    %cst_41 = arith.constant dense<0.000000e+00> : vector<34x128xf32>
    %86 = tpu.matmul %83, %85, %cst_41 {dimension_numbers = #tpu.dot_dimension_numbers<[1], [0], [0], [1], [0, 0, 1, 1], [], []>} : vector<34x128xf32>, vector<128x128xf32>, vector<34x128xf32> -> vector<34x128xf32>
    %87 = arith.addf %82, %86 : vector<34x128xf32>
    %88 = vector.extract_strided_slice %81 {offsets = [1, 0], sizes = [34, 128], strides = [1, 1]} : vector<36x128xf32> to vector<34x128xf32>
    %c1_42 = arith.constant 1 : index
    %c0_43 = arith.constant 0 : index
    %c0_44 = arith.constant 0 : index
    %89 = vector.load %arg3[%c1_42, %c0_43, %c0_44] : memref<3x128x128xf32, #tpu.memory_space<vmem>>, vector<1x128x128xf32>
    %90 = vector.shape_cast %89 : vector<1x128x128xf32> to vector<128x128xf32>
    %cst_45 = arith.constant dense<0.000000e+00> : vector<34x128xf32>
    %91 = tpu.matmul %88, %90, %cst_45 {dimension_numbers = #tpu.dot_dimension_numbers<[1], [0], [0], [1], [0, 0, 1, 1], [], []>} : vector<34x128xf32>, vector<128x128xf32>, vector<34x128xf32> -> vector<34x128xf32>
    %92 = arith.addf %87, %91 : vector<34x128xf32>
    %93 = vector.extract_strided_slice %81 {offsets = [2, 0], sizes = [34, 128], strides = [1, 1]} : vector<36x128xf32> to vector<34x128xf32>
    %c2_46 = arith.constant 2 : index
    %c0_47 = arith.constant 0 : index
    %c0_48 = arith.constant 0 : index
    %94 = vector.load %arg3[%c2_46, %c0_47, %c0_48] : memref<3x128x128xf32, #tpu.memory_space<vmem>>, vector<1x128x128xf32>
    %95 = vector.shape_cast %94 : vector<1x128x128xf32> to vector<128x128xf32>
    %cst_49 = arith.constant dense<0.000000e+00> : vector<34x128xf32>
    %96 = tpu.matmul %93, %95, %cst_49 {dimension_numbers = #tpu.dot_dimension_numbers<[1], [0], [0], [1], [0, 0, 1, 1], [], []>} : vector<34x128xf32>, vector<128x128xf32>, vector<34x128xf32> -> vector<34x128xf32>
    %97 = arith.addf %92, %96 : vector<34x128xf32>
    %cst_50 = arith.constant 0.000000e+00 : f32
    %98 = vector.shape_cast %18 : vector<34x1xi1> to vector<34x1xi1>
    %99 = vector.broadcast %98 : vector<34x1xi1> to vector<34x128xi1>
    %100 = vector.broadcast %cst_50 : f32 to vector<34x128xf32>
    %101 = arith.select %99, %97, %100 : vector<34x128xi1>, vector<34x128xf32>
    %cst_51 = arith.constant dense<0.000000e+00> : vector<128xf32>
    %102 = vector.multi_reduction <add>, %101, %cst_51 [0] : vector<34x128xf32> to vector<128xf32>
    %103 = vector.shape_cast %102 : vector<128xf32> to vector<1x128xf32>
    %cst_52 = arith.constant dense<0.000000e+00> : vector<1x8xf32>
    %104 = tpu.matmul %103, %19, %cst_52 {dimension_numbers = #tpu.dot_dimension_numbers<[1], [0], [0], [1], [0, 0, 1, 1], [], []>} : vector<1x128xf32>, vector<128x8xf32>, vector<1x8xf32> -> vector<1x8xf32>
    %cst_53 = arith.constant 5.120000e+02 : f32
    %105 = vector.broadcast %cst_53 : f32 to vector<1x8xf32>
    %106 = arith.divf %104, %105 : vector<1x8xf32>
    %cst_54 = arith.constant dense<0.000000e+00> : vector<1x128xf32>
    %107 = tpu.matmul %106, %20, %cst_54 {dimension_numbers = #tpu.dot_dimension_numbers<[1], [0], [0], [1], [0, 0, 1, 1], [], []>} : vector<1x8xf32>, vector<8x128xf32>, vector<1x128xf32> -> vector<1x128xf32>
    %108 = vector.broadcast %107 : vector<1x128xf32> to vector<34x128xf32>
    %109 = arith.subf %97, %108 : vector<34x128xf32>
    %cst_55 = arith.constant 0.000000e+00 : f32
    %110 = vector.shape_cast %18 : vector<34x1xi1> to vector<34x1xi1>
    %111 = vector.broadcast %110 : vector<34x1xi1> to vector<34x128xi1>
    %112 = vector.broadcast %cst_55 : f32 to vector<34x128xf32>
    %113 = arith.select %111, %109, %112 : vector<34x128xi1>, vector<34x128xf32>
    %114 = arith.mulf %113, %113 : vector<34x128xf32>
    %cst_56 = arith.constant dense<0.000000e+00> : vector<128xf32>
    %115 = vector.multi_reduction <add>, %114, %cst_56 [0] : vector<34x128xf32> to vector<128xf32>
    %116 = vector.shape_cast %115 : vector<128xf32> to vector<1x128xf32>
    %cst_57 = arith.constant dense<0.000000e+00> : vector<1x8xf32>
    %117 = tpu.matmul %116, %19, %cst_57 {dimension_numbers = #tpu.dot_dimension_numbers<[1], [0], [0], [1], [0, 0, 1, 1], [], []>} : vector<1x128xf32>, vector<128x8xf32>, vector<1x8xf32> -> vector<1x8xf32>
    %cst_58 = arith.constant 5.120000e+02 : f32
    %118 = vector.broadcast %cst_58 : f32 to vector<1x8xf32>
    %119 = arith.divf %117, %118 : vector<1x8xf32>
    %c0_59 = arith.constant 0 : index
    %c0_60 = arith.constant 0 : index
    %120 = vector.load %arg6[%c0_59, %c0_60] : memref<1x8xf32, #tpu.memory_space<vmem>>, vector<1x8xf32>
    %cst_61 = arith.constant 9.99999974E-6 : f32
    %121 = vector.broadcast %cst_61 : f32 to vector<1x8xf32>
    %122 = arith.addf %119, %121 : vector<1x8xf32>
    %123 = math.rsqrt %122 : vector<1x8xf32>
    %124 = arith.mulf %120, %123 : vector<1x8xf32>
    %c0_62 = arith.constant 0 : index
    %c0_63 = arith.constant 0 : index
    %125 = vector.load %arg7[%c0_62, %c0_63] : memref<1x8xf32, #tpu.memory_space<vmem>>, vector<1x8xf32>
    %126 = arith.mulf %106, %124 : vector<1x8xf32>
    %127 = arith.subf %125, %126 : vector<1x8xf32>
    %cst_64 = arith.constant dense<0.000000e+00> : vector<1x128xf32>
    %128 = tpu.matmul %124, %20, %cst_64 {dimension_numbers = #tpu.dot_dimension_numbers<[1], [0], [0], [1], [0, 0, 1, 1], [], []>} : vector<1x8xf32>, vector<8x128xf32>, vector<1x128xf32> -> vector<1x128xf32>
    %cst_65 = arith.constant dense<0.000000e+00> : vector<1x128xf32>
    %129 = tpu.matmul %127, %20, %cst_65 {dimension_numbers = #tpu.dot_dimension_numbers<[1], [0], [0], [1], [0, 0, 1, 1], [], []>} : vector<1x8xf32>, vector<8x128xf32>, vector<1x128xf32> -> vector<1x128xf32>
    %130 = vector.broadcast %128 : vector<1x128xf32> to vector<34x128xf32>
    %131 = arith.mulf %97, %130 : vector<34x128xf32>
    %132 = vector.broadcast %129 : vector<1x128xf32> to vector<34x128xf32>
    %133 = arith.addf %131, %132 : vector<34x128xf32>
    %cst_66 = arith.constant 0.000000e+00 : f32
    %134 = vector.broadcast %cst_66 : f32 to vector<34x128xf32>
    %135 = arith.maximumf %133, %134 : vector<34x128xf32>
    %cst_67 = arith.constant 0.000000e+00 : f32
    %136 = vector.shape_cast %18 : vector<34x1xi1> to vector<34x1xi1>
    %137 = vector.broadcast %136 : vector<34x1xi1> to vector<34x128xi1>
    %138 = vector.broadcast %cst_67 : f32 to vector<34x128xf32>
    %139 = arith.select %137, %135, %138 : vector<34x128xi1>, vector<34x128xf32>
    %140 = vector.extract_strided_slice %139 {offsets = [0, 0], sizes = [16, 128], strides = [1, 1]} : vector<34x128xf32> to vector<16x128xf32>
    %c0_68 = arith.constant 0 : index
    %c0_69 = arith.constant 0 : index
    %c0_70 = arith.constant 0 : index
    %141 = vector.load %arg10[%c0_68, %c0_69, %c0_70] : memref<2x16x128xf32, #tpu.memory_space<vmem>>, vector<1x16x128xf32>
    %142 = vector.shape_cast %141 : vector<1x16x128xf32> to vector<16x128xf32>
    %143 = vector.shape_cast %140 : vector<16x128xf32> to vector<1x16x128xf32>
    tpu.vector_store %arg10[%c0_68, %c0_69, %c0_70], %143 {strides = array<i32>} : memref<2x16x128xf32, #tpu.memory_space<vmem>>, vector<1x16x128xf32>,
    %144 = vector.extract_strided_slice %139 {offsets = [18, 0], sizes = [16, 128], strides = [1, 1]} : vector<34x128xf32> to vector<16x128xf32>
    %c1_71 = arith.constant 1 : index
    %c0_72 = arith.constant 0 : index
    %c0_73 = arith.constant 0 : index
    %145 = vector.load %arg10[%c1_71, %c0_72, %c0_73] : memref<2x16x128xf32, #tpu.memory_space<vmem>>, vector<1x16x128xf32>
    %146 = vector.shape_cast %145 : vector<1x16x128xf32> to vector<16x128xf32>
    %147 = vector.shape_cast %144 : vector<16x128xf32> to vector<1x16x128xf32>
    tpu.vector_store %arg10[%c1_71, %c0_72, %c0_73], %147 {strides = array<i32>} : memref<2x16x128xf32, #tpu.memory_space<vmem>>, vector<1x16x128xf32>,
    return
  }
  func.func @transform_0(%arg0: i32) -> (i32, i32) {
    %c0_i32 = arith.constant 0 : i32
    %c0_i32_0 = arith.constant 0 : i32
    %c0_i32_1 = arith.constant 0 : i32
    return %c0_i32, %c0_i32_0 : i32, i32
  }
  func.func @transform_1(%arg0: i32) -> (i32, i32, i32) {
    %c0_i32 = arith.constant 0 : i32
    %c0_i32_0 = arith.constant 0 : i32
    %c0_i32_1 = arith.constant 0 : i32
    %c0_i32_2 = arith.constant 0 : i32
    return %c0_i32, %c0_i32_0, %c0_i32_1 : i32, i32, i32
  }
  func.func @transform_2(%arg0: i32) -> (i32, i32, i32) {
    %c0_i32 = arith.constant 0 : i32
    %c0_i32_0 = arith.constant 0 : i32
    %c0_i32_1 = arith.constant 0 : i32
    %c0_i32_2 = arith.constant 0 : i32
    return %c0_i32, %c0_i32_0, %c0_i32_1 : i32, i32, i32
  }
  func.func @transform_3(%arg0: i32) -> (i32, i32) {
    %c0_i32 = arith.constant 0 : i32
    %c0_i32_0 = arith.constant 0 : i32
    %c0_i32_1 = arith.constant 0 : i32
    return %c0_i32, %c0_i32_0 : i32, i32
  }
  func.func @transform_4(%arg0: i32) -> (i32, i32) {
    %c0_i32 = arith.constant 0 : i32
    %c0_i32_0 = arith.constant 0 : i32
    %c0_i32_1 = arith.constant 0 : i32
    return %c0_i32, %c0_i32_0 : i32, i32
  }
  func.func @transform_5(%arg0: i32) -> (i32, i32) {
    %c0_i32 = arith.constant 0 : i32
    %c0_i32_0 = arith.constant 0 : i32
    %c0_i32_1 = arith.constant 0 : i32
    return %c0_i32, %c0_i32_0 : i32, i32
  }
  func.func @transform_6(%arg0: i32) -> (i32, i32) {
    %c0_i32 = arith.constant 0 : i32
    %c0_i32_0 = arith.constant 0 : i32
    %c0_i32_1 = arith.constant 0 : i32
    return %c0_i32, %c0_i32_0 : i32, i32
  }
  func.func @transform_7(%arg0: i32) -> (i32, i32) {
    %c0_i32 = arith.constant 0 : i32
    %c0_i32_0 = arith.constant 0 : i32
    %c0_i32_1 = arith.constant 0 : i32
    return %c0_i32, %c0_i32_0 : i32, i32
  }
  func.func @transform_8(%arg0: i32) -> (i32, i32) {
    %c0_i32 = arith.constant 0 : i32
    %c0_i32_0 = arith.constant 0 : i32
    %c0_i32_1 = arith.constant 0 : i32
    return %c0_i32, %c0_i32_0 : i32, i32
  }
  func.func @transform_9(%arg0: i32) -> (i32, i32, i32) {
    %c0_i32 = arith.constant 0 : i32
    %c0_i32_0 = arith.constant 0 : i32
    %c0_i32_1 = arith.constant 0 : i32
    %c0_i32_2 = arith.constant 0 : i32
    return %c0_i32, %c0_i32_0, %c0_i32_1 : i32, i32, i32
  }
}

</mosaic_0001>

<bundles_post_ra>
// kernel: tile.9
= control target key start
LH: loop header
LB: loop body
LE: loop exit
PB: predicated region body
PF: predicated region fallthrough
CT: control target
= control target key end

     0   :  { %vm6_vm0 = vcmask 1043458   ;;  %vm10_vm1 = vcmask 1045508   ;;  %vm14_vm2 = vcmask 1047558   ;;  %s19_s6 = smov 3  ;;  %s22_s7 = smov 12  ;;  %vm16_vm3 = vcmask 64512   ;;  %s736_s0 = inlined_call_operand.vmem [shape: f32[16,8,8], index: 0, kind: input, shape index: {}]   ;;  %s737_s1 = inlined_call_operand.vmem [shape: f32[128,8], index: 1, kind: output, shape index: {}]  }
   0x1   :  { %v348_v0 = vld [vmem:[%s736_s0 + $0xf] ss:$16 sm:%s19_s6]   ;;  %s27_s12 = smov 48  ;;  %s32_s13 = smov 192  ;;  %vm38_vm4 = vcmask 1048512   ;;  %vm60_vm5 = vcmask 982912  }
   0x2   :  { %v349_v1 = vld [vmem:[%s736_s0 + $0xf] ss:$16 sm:%s22_s7]   ;;  %s63_s18 = smov 3  ;;  %s66_s21 = smov 12  ;;  %vm82_vm6 = vcmask 917312   ;;  %vm104_vm7 = vcmask 851712  }
   0x3   :  { %v25_v2 = vsel %vm6_vm0, %v349_v1, %v348_v0  ;;  %v350_v3 = vld [vmem:[%s736_s0 + $0xf] ss:$16 sm:%s27_s12]   ;;  %v356_v6 = vld [vmem:[%s736_s0 + $0xd] ss:$16 sm:%s63_s18]   ;;  %s71_s22 = smov 48  ;;  %s76_s27 = smov 192 }
   0x4   :  { %v351_v4 = vld [vmem:[%s736_s0 + $0xf] ss:$16 sm:%s32_s13]   ;;  %v30_v5 = vsel %vm10_vm1, %v350_v3, %v25_v2  ;;  %v357_v8 = vld [vmem:[%s736_s0 + $0xd] ss:$16 sm:%s66_s21]   ;;  %s423_s28 = smov 120   ;;  %s41_s2 = smov 3 }
   0x5   :  { %v35_v7 = vsel %vm14_vm2, %v351_v4, %v30_v5  ;;  %v358_v9 = vld [vmem:[%s736_s0 + $0xd] ss:$16 sm:%s71_s22]   ;;  %v69_v10 = vsel %vm6_vm0, %v357_v8, %v356_v6  ;;  %s44_s3 = smov 12  ;;  %v352_v13 = vld [vmem:[%s736_s0 + $0xe] ss:$16 sm:%s41_s2]   ;;  %s49_s8 = smov 48 }
   0x6   :  { %36 = vrot.lane.b32.xlu0 %v35_v7, %s423_s28  ;;  %v359_v11 = vld [vmem:[%s736_s0 + $0xd] ss:$16 sm:%s76_s27]   ;;  %v74_v12 = vsel %vm10_vm1, %v358_v9, %v69_v10  ;;  %s54_s9 = smov 192  ;;  %s85_s14 = smov 3  ;;  %vm126_vm8 = vcmask 786112   ;;  %vm148_vm9 = vcmask 720512  }
   0x7   :  { %v353_v14 = vld [vmem:[%s736_s0 + $0xe] ss:$16 sm:%s44_s3]   ;;  %v79_v15 = vsel %vm14_vm2, %v359_v11, %v74_v12  ;;  %s424_s15 = smov 104   ;;  %v360_v20 = vld [vmem:[%s736_s0 + $0xc] ss:$16 sm:%s85_s14]   ;;  %s88_s18 = smov 12 }
   0x8   :  { %v47_v16 = vsel %vm6_vm0, %v353_v14, %v352_v13  ;;  %v354_v17 = vld [vmem:[%s736_s0 + $0xe] ss:$16 sm:%s49_s8]   ;;  %80 = vrot.lane.b32.xlu1 %v79_v15, %s424_s15  ;;  %s93_s19 = smov 48  ;;  %s98_s24 = smov 192  ;;  %vm170_vm10 = vcmask 654912   ;;  %vm192_vm11 = vcmask 589312  }
   0x9   :  { %v355_v18 = vld [vmem:[%s736_s0 + $0xe] ss:$16 sm:%s54_s9]   ;;  %v52_v19 = vsel %vm10_vm1, %v354_v17, %v47_v16  ;;  %v361_v22 = vld [vmem:[%s736_s0 + $0xc] ss:$16 sm:%s88_s18]   ;;  %s425_s25 = smov 112   ;;  %s107_s28 = smov 3 }
   0xa   :  { %v57_v21 = vsel %vm14_vm2, %v355_v18, %v52_v19  ;;  %v362_v23 = vld [vmem:[%s736_s0 + $0xc] ss:$16 sm:%s93_s19]   ;;  %v91_v24 = vsel %vm6_vm0, %v361_v22, %v360_v20  ;;  %s110_s29 = smov 12  ;;  %v364_v27 = vld [vmem:[%s736_s0 + $0xb] ss:$16 sm:%s107_s28]   ;;  %s115_s5 = smov 48 }
   0xb   :  { %58 = vrot.lane.b32.xlu0 %v57_v21, %s425_s25  ;;  %v363_v25 = vld [vmem:[%s736_s0 + $0xc] ss:$16 sm:%s98_s24]   ;;  %v96_v26 = vsel %vm10_vm1, %v362_v23, %v91_v24  ;;  %s120_s6 = smov 192  ;;  %s129_s11 = smov 3  ;;  %vm214_vm12 = vcmask 523712   ;;  %vm236_vm13 = vcmask 458112  }
   0xc   :  { %v365_v28 = vld [vmem:[%s736_s0 + $0xb] ss:$16 sm:%s110_s29]   ;;  %v101_v29 = vsel %vm14_vm2, %v363_v25, %v96_v26  ;;  %s426_s12 = smov 96   ;;  %v368_v34 = vld [vmem:[%s736_s0 + $0xa] ss:$16 sm:%s129_s11]   ;;  %s132_s15 = smov 12 }
   0xd   :  { %v113_v30 = vsel %vm6_vm0, %v365_v28, %v364_v27  ;;  %v366_v31 = vld [vmem:[%s736_s0 + $0xb] ss:$16 sm:%s115_s5]   ;;  %102 = vrot.lane.b32.xlu1 %v101_v29, %s426_s12  ;;  %s137_s16 = smov 48  ;;  %s142_s21 = smov 192  ;;  %vm258_vm14 = vcmask 392512   ;;  %vm280_vm15 = vcmask 326912  }
   0xe   :  { %v367_v32 = vld [vmem:[%s736_s0 + $0xb] ss:$16 sm:%s120_s6]   ;;  %v118_v33 = vsel %vm10_vm1, %v366_v31, %v113_v30  ;;  %v369_v36 = vld [vmem:[%s736_s0 + $0xa] ss:$16 sm:%s132_s15]   ;;  %s427_s22 = smov 88   ;;  %s151_s25 = smov 3 }
   0xf   :  { %v123_v35 = vsel %vm14_vm2, %v367_v32, %v118_v33  ;;  %v370_v37 = vld [vmem:[%s736_s0 + $0xa] ss:$16 sm:%s137_s16]   ;;  %v135_v38 = vsel %vm6_vm0, %v369_v36, %v368_v34  ;;  %s154_s26 = smov 12  ;;  %v372_v41 = vld [vmem:[%s736_s0 + $0x9] ss:$16 sm:%s151_s25]   ;;  %s159_s2 = smov 48 }
  0x10   :  { %124 = vrot.lane.b32.xlu0 %v123_v35, %s427_s22  ;;  %v371_v39 = vld [vmem:[%s736_s0 + $0xa] ss:$16 sm:%s142_s21]   ;;  %v140_v40 = vsel %vm10_vm1, %v370_v37, %v135_v38  ;;  %s164_s3 = smov 192  ;;  %s173_s8 = smov 3 }
  0x11   :  { %v373_v42 = vld [vmem:[%s736_s0 + $0x9] ss:$16 sm:%s154_s26]   ;;  %v145_v43 = vsel %vm14_vm2, %v371_v39, %v140_v40  ;;  %s428_s9 = smov 80   ;;  %v376_v48 = vld [vmem:[%s736_s0 + $0x8] ss:$16 sm:%s173_s8]   ;;  %s176_s12 = smov 12 }
  0x12   :  { %v157_v44 = vsel %vm6_vm0, %v373_v42, %v372_v41  ;;  %v374_v45 = vld [vmem:[%s736_s0 + $0x9] ss:$16 sm:%s159_s2]   ;;  %146 = vrot.lane.b32.xlu1 %v145_v43, %s428_s9  ;;  %s181_s13 = smov 48  ;;  %s186_s18 = smov 192 }
  0x13   :  { %v375_v46 = vld [vmem:[%s736_s0 + $0x9] ss:$16 sm:%s164_s3]   ;;  %v162_v47 = vsel %vm10_vm1, %v374_v45, %v157_v44  ;;  %v377_v50 = vld [vmem:[%s736_s0 + $0x8] ss:$16 sm:%s176_s12]   ;;  %s429_s19 = smov 72   ;;  %s195_s22 = smov 3 }
  0x14   :  { %v167_v49 = vsel %vm14_vm2, %v375_v46, %v162_v47  ;;  %v378_v51 = vld [vmem:[%s736_s0 + $0x8] ss:$16 sm:%s181_s13]   ;;  %v179_v52 = vsel %vm6_vm0, %v377_v50, %v376_v48  ;;  %s198_s23 = smov 12  ;;  %v380_v55 = vld [vmem:[%s736_s0 + $0x7] ss:$16 sm:%s195_s22]   ;;  %s203_s28 = smov 48 }
  0x15   :  { %168 = vrot.lane.b32.xlu0 %v167_v49, %s429_s19  ;;  %v379_v53 = vld [vmem:[%s736_s0 + $0x8] ss:$16 sm:%s186_s18]   ;;  %v184_v54 = vsel %vm10_vm1, %v378_v51, %v179_v52  ;;  %s208_s29 = smov 192  ;;  %s217_s5 = smov 3 }
  0x16   :  { %v381_v56 = vld [vmem:[%s736_s0 + $0x7] ss:$16 sm:%s198_s23]   ;;  %v189_v57 = vsel %vm14_vm2, %v379_v53, %v184_v54  ;;  %s430_s6 = smov 64   ;;  %v384_v62 = vld [vmem:[%s736_s0 + $0x6] ss:$16 sm:%s217_s5]   ;;  %s220_s9 = smov 12 }
  0x17   :  { %v201_v58 = vsel %vm6_vm0, %v381_v56, %v380_v55  ;;  %v382_v59 = vld [vmem:[%s736_s0 + $0x7] ss:$16 sm:%s203_s28]   ;;  %190 = vrot.lane.b32.xlu1 %v189_v57, %s430_s6  ;;  %s225_s10 = smov 48  ;;  %s230_s15 = smov 192 }
  0x18   :  { %v383_v60 = vld [vmem:[%s736_s0 + $0x7] ss:$16 sm:%s208_s29]   ;;  %v206_v61 = vsel %vm10_vm1, %v382_v59, %v201_v58  ;;  %v385_v0 = vld [vmem:[%s736_s0 + $0x6] ss:$16 sm:%s220_s9]   ;;  %s431_s16 = smov 56   ;;  %s239_s19 = smov 3 }
  0x19   :  { %v211_v63 = vsel %vm14_vm2, %v383_v60, %v206_v61  ;;  %v386_v1 = vld [vmem:[%s736_s0 + $0x6] ss:$16 sm:%s225_s10]   ;;  %v223_v2 = vsel %vm6_vm0, %v385_v0, %v384_v62  ;;  %s242_s20 = smov 12  ;;  %v388_v5 = vld [vmem:[%s736_s0 + $0x5] ss:$16 sm:%s239_s19]   ;;  %s247_s25 = smov 48 }
  0x1a   :  { %212 = vrot.lane.b32.xlu0 %v211_v63, %s431_s16  ;;  %v387_v3 = vld [vmem:[%s736_s0 + $0x6] ss:$16 sm:%s230_s15]   ;;  %v228_v4 = vsel %vm10_vm1, %v386_v1, %v223_v2  ;;  %s252_s26 = smov 192  ;;  %s261_s2 = smov 3 }
  0x1b   :  { %v389_v6 = vld [vmem:[%s736_s0 + $0x5] ss:$16 sm:%s242_s20]   ;;  %v233_v7 = vsel %vm14_vm2, %v387_v3, %v228_v4  ;;  %s432_s3 = smov 48   ;;  %v392_v12 = vld [vmem:[%s736_s0 + $0x4] ss:$16 sm:%s261_s2]   ;;  %s264_s6 = smov 12 }
  0x1c   :  { %v245_v8 = vsel %vm6_vm0, %v389_v6, %v388_v5  ;;  %v390_v9 = vld [vmem:[%s736_s0 + $0x5] ss:$16 sm:%s247_s25]   ;;  %234 = vrot.lane.b32.xlu1 %v233_v7, %s432_s3  ;;  %s269_s7 = smov 48  ;;  %s274_s12 = smov 192 }
  0x1d   :  { %v391_v10 = vld [vmem:[%s736_s0 + $0x5] ss:$16 sm:%s252_s26]   ;;  %v250_v11 = vsel %vm10_vm1, %v390_v9, %v245_v8  ;;  %v393_v14 = vld [vmem:[%s736_s0 + $0x4] ss:$16 sm:%s264_s6]   ;;  %s433_s13 = smov 40   ;;  %s283_s16 = smov 3 }
  0x1e   :  { %v255_v13 = vsel %vm14_vm2, %v391_v10, %v250_v11  ;;  %v394_v15 = vld [vmem:[%s736_s0 + $0x4] ss:$16 sm:%s269_s7]   ;;  %v267_v16 = vsel %vm6_vm0, %v393_v14, %v392_v12  ;;  %s286_s17 = smov 12  ;;  %v396_v19 = vld [vmem:[%s736_s0 + $0x3] ss:$16 sm:%s283_s16]   ;;  %s291_s22 = smov 48 }
  0x1f   :  { %256 = vrot.lane.b32.xlu0 %v255_v13, %s433_s13  ;;  %v395_v17 = vld [vmem:[%s736_s0 + $0x4] ss:$16 sm:%s274_s12]   ;;  %v272_v18 = vsel %vm10_vm1, %v394_v15, %v267_v16  ;;  %s296_s23 = smov 192  ;;  %s305_s28 = smov 3 }
  0x20   :  { %v397_v20 = vld [vmem:[%s736_s0 + $0x3] ss:$16 sm:%s286_s17]   ;;  %v277_v21 = vsel %vm14_vm2, %v395_v17, %v272_v18  ;;  %s434_s29 = smov 32   ;;  %v400_v26 = vld [vmem:[%s736_s0 + $0x2] ss:$16 sm:%s305_s28]   ;;  %s308_s3 = smov 12 }
  0x21   :  { %v289_v22 = vsel %vm6_vm0, %v397_v20, %v396_v19  ;;  %v398_v23 = vld [vmem:[%s736_s0 + $0x3] ss:$16 sm:%s291_s22]   ;;  %278 = vrot.lane.b32.xlu1 %v277_v21, %s434_s29  ;;  %s313_s4 = smov 48  ;;  %s318_s9 = smov 192 }
  0x22   :  { %v399_v24 = vld [vmem:[%s736_s0 + $0x3] ss:$16 sm:%s296_s23]   ;;  %v294_v25 = vsel %vm10_vm1, %v398_v23, %v289_v22  ;;  %v401_v28 = vld [vmem:[%s736_s0 + $0x2] ss:$16 sm:%s308_s3]   ;;  %s435_s10 = smov 24   ;;  %s327_s13 = smov 3 }
  0x23   :  { %v299_v27 = vsel %vm14_vm2, %v399_v24, %v294_v25  ;;  %v402_v29 = vld [vmem:[%s736_s0 + $0x2] ss:$16 sm:%s313_s4]   ;;  %v311_v30 = vsel %vm6_vm0, %v401_v28, %v400_v26  ;;  %s330_s14 = smov 12  ;;  %v404_v33 = vld [vmem:[%s736_s0 + $0x1] ss:$16 sm:%s327_s13]   ;;  %s335_s19 = smov 48 }
  0x24   :  { %300 = vrot.lane.b32.xlu0 %v299_v27, %s435_s10  ;;  %v403_v31 = vld [vmem:[%s736_s0 + $0x2] ss:$16 sm:%s318_s9]   ;;  %v316_v32 = vsel %vm10_vm1, %v402_v29, %v311_v30  ;;  %s340_s20 = smov 192  ;;  %s2_s25 = smov 3 }
  0x25   :  { %v405_v34 = vld [vmem:[%s736_s0 + $0x1] ss:$16 sm:%s330_s14]   ;;  %v321_v35 = vsel %vm14_vm2, %v403_v31, %v316_v32  ;;  %s436_s26 = smov 16   ;;  %s4_s27 = smov 12  ;;  %v3_v40 = vld [vmem:[%s736_s0] ss:$16 sm:%s2_s25]  }
  0x26   :  { %v333_v36 = vsel %vm6_vm0, %v405_v34, %v404_v33  ;;  %v406_v37 = vld [vmem:[%s736_s0 + $0x1] ss:$16 sm:%s335_s19]   ;;  %322 = vrot.lane.b32.xlu1 %v321_v35, %s436_s26  ;;  %s8_s28 = smov 48  ;;  %s12_s2 = smov 192 }
  0x27   :  { %v407_v38 = vld [vmem:[%s736_s0 + $0x1] ss:$16 sm:%s340_s20]   ;;  %v338_v39 = vsel %vm10_vm1, %v406_v37, %v333_v36  ;;  %v5_v42 = vld [vmem:[%s736_s0] ss:$16 sm:%s4_s27]   ;;  %s437_s7 = smov 8  }
  0x28   :  { %v343_v41 = vsel %vm14_vm2, %v407_v38, %v338_v39  ;;  %v9_v43 = vld [vmem:[%s736_s0] ss:$16 sm:%s8_s28]   ;;  %v7_v44 = vsel %vm6_vm0, %v5_v42, %v3_v40  ;;  %vm302_vm0 = vcmask 261312  }
  0x29   :  { %344 = vrot.lane.b32.xlu0 %v343_v41, %s437_s7  ;;  %v13_v45 = vld [vmem:[%s736_s0] ss:$16 sm:%s12_s2]   ;;  %v11_v46 = vsel %vm10_vm1, %v9_v43, %v7_v44  ;;  %vm324_vm1 = vcmask 195712  }
  0x2a   :  { %v15_v47 = vsel %vm14_vm2, %v13_v45, %v11_v46  ;;  %vm346_vm2 = vcmask 130112  }
  0x2b   :  { %17 = vst.msk [vmem:[%s737_s1] sm:$0xff] %vm16_vm3, %v15_v47  }
  0x78   :  { %v37_v48 = vpop.permute.xlu0 %36  }
  0x79   :  { %39 = vst.msk [vmem:[%s737_s1] sm:$0xff] %vm38_vm4, %v37_v48  }
  0x7a   :  { %v81_v49 = vpop.permute.xlu1 %80  }
  0x7d   :  { %v59_v50 = vpop.permute.xlu0 %58  }
  0x7e   :  { %61 = vst.msk [vmem:[%s737_s1] sm:$0xff] %vm60_vm5, %v59_v50  }
  0x7f   :  { %83 = vst.msk [vmem:[%s737_s1] sm:$0xff] %vm82_vm6, %v81_v49   ;;  %v103_v51 = vpop.permute.xlu1 %102  }
  0x80   :  { %105 = vst.msk [vmem:[%s737_s1] sm:$0xff] %vm104_vm7, %v103_v51  }
  0x82   :  { %v125_v52 = vpop.permute.xlu0 %124  }
  0x83   :  { %127 = vst.msk [vmem:[%s737_s1] sm:$0xff] %vm126_vm8, %v125_v52  }
  0x84   :  { %v147_v53 = vpop.permute.xlu1 %146  }
  0x85   :  { %149 = vst.msk [vmem:[%s737_s1] sm:$0xff] %vm148_vm9, %v147_v53  }
  0x87   :  { %v169_v54 = vpop.permute.xlu0 %168  }
  0x88   :  { %171 = vst.msk [vmem:[%s737_s1] sm:$0xff] %vm170_vm10, %v169_v54  }
  0x89   :  { %v191_v55 = vpop.permute.xlu1 %190  }
  0x8a   :  { %193 = vst.msk [vmem:[%s737_s1] sm:$0xff] %vm192_vm11, %v191_v55  }
  0x8c   :  { %v213_v56 = vpop.permute.xlu0 %212  }
  0x8d   :  { %215 = vst.msk [vmem:[%s737_s1] sm:$0xff] %vm214_vm12, %v213_v56  }
  0x8e   :  { %v235_v57 = vpop.permute.xlu1 %234  }
  0x8f   :  { %237 = vst.msk [vmem:[%s737_s1] sm:$0xff] %vm236_vm13, %v235_v57  }
  0x91   :  { %v257_v58 = vpop.permute.xlu0 %256  }
  0x92   :  { %259 = vst.msk [vmem:[%s737_s1] sm:$0xff] %vm258_vm14, %v257_v58  }
  0x93   :  { %v279_v59 = vpop.permute.xlu1 %278  }
  0x94   :  { %281 = vst.msk [vmem:[%s737_s1] sm:$0xff] %vm280_vm15, %v279_v59  }
  0x96   :  { %v301_v60 = vpop.permute.xlu0 %300  }
  0x97   :  { %303 = vst.msk [vmem:[%s737_s1] sm:$0xff] %vm302_vm0, %v301_v60  }
  0x98   :  { %v323_v61 = vpop.permute.xlu1 %322  }
  0x99   :  { %325 = vst.msk [vmem:[%s737_s1] sm:$0xff] %vm324_vm1, %v323_v61  }
  0x9b   :  { %v345_v62 = vpop.permute.xlu0 %344  }
  0x9c   :  { %347 = vst.msk [vmem:[%s737_s1] sm:$0xff] %vm346_vm2, %v345_v62  }

// kernel: basic_block_forward.1
= control target key start
LH: loop header
LB: loop body
LE: loop exit
PB: predicated region body
PF: predicated region fallthrough
CT: control target
= control target key end

     0   :  { %v2709_v0 = vmov 0.0|0.0   ;;  %vm2710_vm0 = vmmov 0   ;;  %v2711_v4 = vmov 0.0   ;;  %vm167_vm1 = vcmask 1046528   ;;  %s3582_s1 = inlined_call_operand.vmem [shape: f32[3,64,128], index: 1, kind: input, shape index: {}]   ;;  %s3583_s0 = inlined_call_operand.vmem [shape: f32[36,64], index: 0, kind: input, shape index: {}]   ;;  %s3584_s7 = inlined_call_operand.vmem [shape: f32[128,8], index: 7, kind: input, shape index: {}]   ;;  %s3585_s8 = inlined_call_operand.vmem [shape: f32[8,128], index: 8, kind: input, shape index: {}]   ;;  %s3586_s3 = inlined_call_operand.vmem [shape: f32[1,8], index: 3, kind: input, shape index: {}]   ;;  %s3587_s2 = inlined_call_operand.vmem [shape: f32[3,128,128], index: 2, kind: input, shape index: {}]   ;;  %s3588_s4 = inlined_call_operand.vmem [shape: f32[1,8], index: 4, kind: input, shape index: {}]   ;;  %s3589_s5 = inlined_call_operand.vmem [shape: f32[1,8], index: 5, kind: input, shape index: {}]   ;;  %s3590_s6 = inlined_call_operand.vmem [shape: f32[1,8], index: 6, kind: input, shape index: {}]   ;;  %s3591_s9 = inlined_call_operand.vmem [shape: f32[2,16,128], index: 9, kind: output, shape index: {}]  }
   0x1   :  { %2448 = vmatprep.subr.bf16.mxu0 %v2709_v0  ;;  %v1787_v1 = vld [vmem:[%s3582_s1 + $0x40] sm:$0xff]  ;;  %v1788_v2 = vld [vmem:[%s3582_s1 + $0x48] sm:$0xff]  ;;  %v1789_v3 = vld [vmem:[%s3582_s1 + $0x50] sm:$0xff]  ;;  %2060 = vmatprep.mubr.msk.f32.mxu0 %vm2710_vm0, %v2711_v4  ;;  %vm177_vm2 = vcmask 523264   ;;  %vm387_vm3 = vcmask 1045504  }
   0x2   :  { %v2449_v5 = vpack.c.bf16 %v1788_v2, %v1787_v1  ;;  %v1790_v6 = vld [vmem:[%s3582_s1 + $0x58] sm:$0xff]  ;;  %2172 = vmatprep.subr.mxu1 %v2711_v4  ;;  %2174 = vmatprep.mubr.msk.f32.mxu1 %vm2710_vm0, %v2711_v4  ;;  %v1791_v8 = vld [vmem:[%s3582_s1 + $0x60] sm:$0xff]  ;;  %v1792_v9 = vld [vmem:[%s3582_s1 + $0x68] sm:$0xff] }
   0x3   :  { %v2452_v7 = vpack.c.bf16 %v1790_v6, %v1789_v3  ;;  %v2455_v10 = vpack.c.bf16 %v1792_v9, %v1791_v8  ;;  %v1793_v11 = vld [vmem:[%s3582_s1 + $0x70] sm:$0xff]  ;;  %v1794_v12 = vld [vmem:[%s3582_s1 + $0x78] sm:$0xff]  ;;  %v2797_v13 = vld [vmem:[%s3583_s0] sm:$0xff] }
   0x4   :  { %2450 = vmatpush3.bf16.msra.mxu0 %v2449_v5  ;;  %v2802_v14 = vld [vmem:[%s3583_s0 + $0x8] sm:$0xff]  ;;  %v2458_v15 = vpack.c.bf16 %v1794_v12, %v1793_v11  ;;  %v168_v16 = vrot.slane %v2797_v13, 1  ;;  %v145_v18 = vld [vmem:[%s3582_s1] sm:$0xff]  ;;  %v2816_v20 = vld [vmem:[%s3583_s0 + $0x10] sm:$0xff]  ;;  %v388_v52 = vrot.slane %v2797_v13, 2 }
   0x5   :  { %2451 = vmatprep.subr.bf16.mxu0 %v2709_v0  ;;  %v169_v17 = vrot.slane %v2802_v14, 1  ;;  %v146_v19 = vld [vmem:[%s3582_s1 + $0x8] sm:$0xff]  ;;  %v171_v23 = vrot.slane %v2816_v20, 1  ;;  %v147_v24 = vld [vmem:[%s3582_s1 + $0x10] sm:$0xff]  ;;  %v148_v25 = vld [vmem:[%s3582_s1 + $0x18] sm:$0xff]  ;;  %v389_v53 = vrot.slane %v2802_v14, 2 }
   0x6   :  { %v2461_v22 = vpack.c.bf16 %v146_v19, %v145_v18  ;;  %v2830_v26 = vld [vmem:[%s3583_s0 + $0x18] sm:$0xff]  ;;  %v2464_v28 = vpack.c.bf16 %v148_v25, %v147_v24  ;;  %v149_v30 = vld [vmem:[%s3582_s1 + $0x20] sm:$0xff]  ;;  %v150_v31 = vld [vmem:[%s3582_s1 + $0x28] sm:$0xff]  ;;  %v391_v55 = vrot.slane %v2816_v20, 2 }
   0x7   :  { %v170_v21 = vsel %vm167_vm1, %v168_v16, %v169_v17  ;;  %v172_v27 = vsel %vm167_vm1, %v169_v17, %v171_v23  ;;  %v173_v29 = vrot.slane %v2830_v26, 1  ;;  %v2847_v32 = vld [vmem:[%s3583_s0 + $0x20] sm:$0xf]  ;;  %v2467_v34 = vpack.c.bf16 %v150_v31, %v149_v30  ;;  %v151_v36 = vld [vmem:[%s3582_s1 + $0x30] sm:$0xff]  ;;  %v152_v37 = vld [vmem:[%s3582_s1 + $0x38] sm:$0xff] }
   0x8   :  { %2453 = vmatpush3.bf16.msra.mxu0 %v2452_v7  ;;  %v175_v35 = vrot.slane %v2847_v32, 1  ;;  %v2470_v39 = vpack.c.bf16 %v152_v37, %v151_v36  ;;  %v1805_v40 = vld [vmem:[%s3582_s1 + $0x80] sm:$0xff]  ;;  %v1806_v41 = vld [vmem:[%s3582_s1 + $0x88] sm:$0xff]  ;;  %v1807_v43 = vld [vmem:[%s3582_s1 + $0x90] sm:$0xff]  ;;  %v390_v54 = vsel %vm387_vm3, %v388_v52, %v389_v53  ;;  %v392_v56 = vsel %vm387_vm3, %v389_v53, %v391_v55 }
   0x9   :  { %2454 = vmatprep.subr.bf16.mxu0 %v2709_v0  ;;  %v174_v33 = vsel %vm167_vm1, %v171_v23, %v173_v29  ;;  %v2473_v42 = vpack.c.bf16 %v1806_v41, %v1805_v40  ;;  %v1808_v44 = vld [vmem:[%s3582_s1 + $0x98] sm:$0xff]  ;;  %v1809_v46 = vld [vmem:[%s3582_s1 + $0xa0] sm:$0xff]  ;;  %v1810_v47 = vld [vmem:[%s3582_s1 + $0xa8] sm:$0xff]  ;;  %v393_v57 = vrot.slane %v2830_v26, 2  ;;  %v395_v59 = vrot.slane %v2847_v32, 2 }
   0xa   :  { %v176_v38 = vsel %vm167_vm1, %v173_v29, %v175_v35  ;;  %v2476_v45 = vpack.c.bf16 %v1808_v44, %v1807_v43  ;;  %v2479_v48 = vpack.c.bf16 %v1810_v47, %v1809_v46  ;;  %v1811_v49 = vld [vmem:[%s3582_s1 + $0xb0] sm:$0xff]  ;;  %v1812_v50 = vld [vmem:[%s3582_s1 + $0xb8] sm:$0xff]  ;;  %v123_v61 = vld [vmem:[%s3584_s7] sm:$0xff]  ;;  %v32_v23 = vlaneseq }
   0xb   :  { %v2482_v51 = vpack.c.bf16 %v1812_v50, %v1811_v49  ;;  %v394_v58 = vsel %vm387_vm3, %v391_v55, %v393_v57  ;;  %v396_v60 = vsel %vm387_vm3, %v393_v57, %v395_v59  ;;  %v124_v62 = vld [vmem:[%s3584_s7 + $0x8] sm:$0xff]  ;;  %v125_v1 = vld [vmem:[%s3584_s7 + $0x10] sm:$0xff]  ;;  %v126_v2 = vld [vmem:[%s3584_s7 + $0x18] sm:$0xff] }
   0xc   :  { %2456 = vmatpush3.bf16.msra.mxu0 %v2455_v10  ;;  %v2951_v63 = vpack.c.bf16 %v124_v62, %v123_v61  ;;  %v2961_v3 = vpack.c.bf16 %v126_v2, %v125_v1  ;;  %v127_v5 = vld [vmem:[%s3584_s7 + $0x20] sm:$0xff]  ;;  %v128_v6 = vld [vmem:[%s3584_s7 + $0x28] sm:$0xff]  ;;  %v129_v8 = vld [vmem:[%s3584_s7 + $0x30] sm:$0xff]  ;;  %v3025_v24 = vshrl.u32 %v32_v23, 7 }
   0xd   :  { %2457 = vmatprep.subr.bf16.mxu0 %v2709_v0  ;;  %v2971_v7 = vpack.c.bf16 %v128_v6, %v127_v5  ;;  %v130_v9 = vld [vmem:[%s3584_s7 + $0x38] sm:$0xff]  ;;  %v131_v11 = vld [vmem:[%s3584_s7 + $0x40] sm:$0xff]  ;;  %v132_v12 = vld [vmem:[%s3584_s7 + $0x48] sm:$0xff] }
   0xe   :  { %v2981_v10 = vpack.c.bf16 %v130_v9, %v129_v8  ;;  %v135_v17 = vld [vmem:[%s3584_s7 + $0x60] sm:$0xff]  ;;  %v136_v18 = vld [vmem:[%s3584_s7 + $0x68] sm:$0xff]  ;;  %v34_v25 = vadd.s32 8, %v3025_v24  ;;  %v35_v30 = vadd.s32 16, %v3025_v24 }
   0xf   :  { %v3011_v19 = vpack.c.bf16 %v136_v18, %v135_v17 }
  0x10   :  { %2459 = vmatpush3.bf16.msra.mxu0 %v2458_v15  ;;  %v134_v15 = vld [vmem:[%s3584_s7 + $0x58] sm:$0xff] }
  0x11   :  { %2460 = vmatprep.subr.bf16.mxu0 %v2709_v0 }
  0x13   :  { %2061 = vmatmul.mubr.msk.f32.vlgmr.msra.gmra.mrb[0].mxu0 %vm177_vm2, %v170_v21  ;;  %v138_v21 = vld [vmem:[%s3584_s7 + $0x78] sm:$0xff] }
  0x14   :  { %2462 = vmatpush3.bf16.msra.mxu0 %v2461_v22  ;;  %2063 = vmatprep.mubr.msk.f32.mxu0 %vm2710_vm0, %v2711_v4 }
  0x15   :  { %2463 = vmatprep.subr.bf16.mxu0 %v2709_v0 }
  0x17   :  { %2064 = vmatmul.mubr.msk.f32.gmra.mrb[2].mxu0 %vm177_vm2, %v172_v27 }
  0x18   :  { %2465 = vmatpush3.bf16.msra.mxu0 %v2464_v28  ;;  %2066 = vmatprep.mubr.msk.f32.mxu0 %vm2710_vm0, %v2711_v4  ;;  %v3032_v28 = vmul.u32.u64.low 3817748708, %v34_v25  ;;  %v3033_v29 = vmul.u32.u64.high 3817748708, %v34_v25, %v3032_v28 }
  0x19   :  { %2466 = vmatprep.subr.bf16.mxu0 %v2709_v0 }
  0x1b   :  { %2067 = vmatmul.mubr.msk.f32.gmra.mrb[4].mxu0 %vm177_vm2, %v174_v33  ;;  %v36_v33 = vadd.s32 24, %v3025_v24 }
  0x1c   :  { %2069 = vmatprep.mubr.msk.f32.mxu0 %vm2710_vm0, %v2711_v4  ;;  %2468 = vmatpush3.bf16.msra.mxu0 %v2467_v34 }
  0x1d   :  { %2469 = vmatprep.subr.bf16.mxu0 %v2709_v0  ;;  %v3042_v36 = vmul.u32.u64.low 3817748708, %v36_v33  ;;  %v3043_v37 = vmul.u32.u64.high 3817748708, %v36_v33, %v3042_v36 }
  0x1f   :  { %2070 = vmatmul.mubr.msk.f32.gmra.mrb[6].mxu0 %vm177_vm2, %v176_v38  ;;  %v37_v38 = vadd.s32 32, %v3025_v24  ;;  %v77_v47 = vshrl.u32 %v3043_v37, 4 }
  0x20   :  { %2072 = vmatprep.mubr.msk.f32.mxu0 %vm2710_vm0, %v2711_v4  ;;  %2471 = vmatpush3.bf16.msra.mxu0 %v2470_v39 }
  0x21   :  { %2472 = vmatprep.subr.bf16.mxu0 %v2709_v0  ;;  %v78_v49 = vmul.u32 18, %v77_v47 }
  0x23   :  { %2073 = vmatmul.mubr.msk.f32.gmra.mrb[8].mxu0 %vm177_vm2, %v175_v35  ;;  %v55_v35 = vshrl.u32 %v3033_v29, 4 }
  0x24   :  { %2091 = vmatprep.mubr.msk.f32.mxu0 %vm2710_vm0, %v2711_v4 }
  0x25   :  { %v56_v40 = vmul.u32 18, %v55_v35 }
  0x27   :  { %2092 = vmatmul.mubr.msk.f32.vlgmr.msra.gmra.mrb[0].mxu0 %vm177_vm2, %v2797_v13  ;;  %v2991_v13 = vpack.c.bf16 %v132_v12, %v131_v11 }
  0x28   :  { %2474 = vmatpush3.bf16.msra.mxu0 %v2473_v42  ;;  %2094 = vmatprep.mubr.msk.f32.mxu0 %vm2710_vm0, %v2711_v4  ;;  %v3047_v42 = vmul.u32.u64.low 3817748708, %v37_v38  ;;  %v3048_v43 = vmul.u32.u64.high 3817748708, %v37_v38, %v3047_v42 }
  0x29   :  { %2475 = vmatprep.subr.bf16.mxu0 %v2709_v0 }
  0x2a   :  { %v88_v50 = vshrl.u32 %v3048_v43, 4 }
  0x2b   :  { %2095 = vmatmul.mubr.msk.f32.gmra.mrb[2].mxu0 %vm177_vm2, %v2802_v14  ;;  %v133_v14 = vld [vmem:[%s3584_s7 + $0x50] sm:$0xff] }
  0x2c   :  { %2477 = vmatpush3.bf16.msra.mxu0 %v2476_v45  ;;  %2097 = vmatprep.mubr.msk.f32.mxu0 %vm2710_vm0, %v2711_v4  ;;  %v3001_v16 = vpack.c.bf16 %v134_v15, %v133_v14  ;;  %v57_v45 = vsub.s32 %v34_v25, %v56_v40  ;;  %v89_v55 = vmul.u32 18, %v88_v50 }
  0x2d   :  { %2478 = vmatprep.subr.bf16.mxu0 %v2709_v0 }
  0x2e   :  { %vm94_vm6 = vcmp.ne.s32.totalorder %v57_v45, 0  ;;  %vm99_vm7 = vcmp.lt.s32.totalorder %v57_v45, 0  ;;  %v109_v53 = vadd.s32 18, %v57_v45  ;;  %v90_v62 = vsub.s32 %v37_v38, %v89_v55 }
  0x2f   :  { %2098 = vmatmul.mubr.msk.f32.gmra.mrb[4].mxu0 %vm177_vm2, %v2816_v20  ;;  %v137_v20 = vld [vmem:[%s3584_s7 + $0x70] sm:$0xff]  ;;  %vm104_vm9 = vmand %vm99_vm7, %vm94_vm6 }
  0x30   :  { %2100 = vmatprep.mubr.msk.f32.mxu0 %vm2710_vm0, %v2711_v4  ;;  %2480 = vmatpush3.bf16.msra.mxu0 %v2479_v48  ;;  %v3021_v22 = vpack.c.bf16 %v138_v21, %v137_v20  ;;  %v114_v57 = vsel %vm104_vm9, %v109_v53, %v57_v45  ;;  %vm102_vm6 = vcmp.lt.s32.totalorder %v90_v62, 0  ;;  %v112_v18 = vadd.s32 18, %v90_v62 }
  0x31   :  { %2481 = vmatprep.subr.bf16.mxu0 %v2709_v0 }
  0x33   :  { %2101 = vmatmul.mubr.msk.f32.gmra.mrb[6].mxu0 %vm177_vm2, %v2830_v26  ;;  %v3029_v26 = vmul.u32.u64.low 3817748708, %v3025_v24  ;;  %v3030_v27 = vmul.u32.u64.high 3817748708, %v3025_v24, %v3029_v26 }
  0x34   :  { %2103 = vmatprep.mubr.msk.f32.mxu0 %vm2710_vm0, %v2711_v4  ;;  %2483 = vmatpush3.bf16.msra.mxu0 %v2482_v51 }
  0x35   :  { %2484 = vmatprep.subr.bf16.mxu0 %v2709_v0  ;;  %v44_v34 = vshrl.u32 %v3030_v27, 4 }
  0x37   :  { %2104 = vmatmul.mubr.msk.f32.gmra.mrb[8].mxu0 %vm177_vm2, %v2847_v32  ;;  %v3036_v31 = vmul.u32.u64.low 3817748708, %v35_v30  ;;  %v3037_v32 = vmul.u32.u64.high 3817748708, %v35_v30, %v3036_v31  ;;  %v45_v39 = vmul.u32 18, %v44_v34 }
  0x38   :  { %2122 = vmatprep.mubr.msk.f32.mxu0 %vm2710_vm0, %v2711_v4 }
  0x39   :  { %v66_v41 = vshrl.u32 %v3037_v32, 4  ;;  %v46_v44 = vsub.s32 %v3025_v24, %v45_v39 }
  0x3b   :  { %2123 = vmatmul.mubr.msk.f32.vlgmr.msra.gmra.mrb[0].mxu0 %vm177_vm2, %v390_v54  ;;  %v67_v46 = vmul.u32 18, %v66_v41  ;;  %vm93_vm4 = vcmp.ne.s32.totalorder %v46_v44, 0  ;;  %vm98_vm5 = vcmp.lt.s32.totalorder %v46_v44, 0  ;;  %v108_v52 = vadd.s32 18, %v46_v44 }
  0x3c   :  { %2125 = vmatprep.mubr.msk.f32.mxu0 %vm2710_vm0, %v2711_v4  ;;  %2486 = vmatpush3.bf16.msra.mxu0 %v2951_v63  ;;  %vm3053_vm8 = vmand %vm98_vm5, %vm93_vm4  ;;  %v79_v54 = vsub.s32 %v36_v33, %v78_v49  ;;  %vm97_vm5 = vcmp.ne.s32.totalorder %v90_v62, 0 }
  0x3d   :  { %2487 = vmatprep.subr.bf16.mxu0 %v2709_v0  ;;  %v68_v48 = vsub.s32 %v35_v30, %v67_v46 }
  0x3e   :  { %vm96_vm13 = vcmp.ne.s32.totalorder %v79_v54, 0  ;;  %vm101_vm14 = vcmp.lt.s32.totalorder %v79_v54, 0  ;;  %v111_v6 = vadd.s32 18, %v79_v54 }
  0x3f   :  { %2126 = vmatmul.mubr.msk.f32.gmra.mrb[2].mxu0 %vm177_vm2, %v392_v56  ;;  %vm95_vm10 = vcmp.ne.s32.totalorder %v68_v48, 0  ;;  %vm100_vm11 = vcmp.lt.s32.totalorder %v68_v48, 0  ;;  %v113_v56 = vsel %vm3053_vm8, %v108_v52, %v46_v44  ;;  %vm106_vm4 = vmand %vm101_vm14, %vm96_vm13  ;;  %v3132_v44 = vld [vmem:[%s3585_s8] sm:$0xff]  ;;  %vm962_vm13 = vcmask 1040384  }
  0x40   :  { %2128 = vmatprep.mubr.msk.f32.mxu0 %vm2710_vm0, %v2711_v4  ;;  %2489 = vmatpush3.bf16.msra.mxu0 %v2961_v3  ;;  %vm3061_vm12 = vmand %vm100_vm11, %vm95_vm10  ;;  %vm3065_vm15 = vcmp.lt.s32.totalorder %v113_v56, 16  ;;  %v116_v17 = vsel %vm106_vm4, %v111_v6, %v79_v54  ;;  %vm520_vm11 = vcmask 1041408   ;;  %vm978_vm14 = vcmask 1042432  }
  0x41   :  { %2490 = vmatprep.subr.bf16.mxu0 %v2709_v0  ;;  %vm107_vm8 = vmand %vm102_vm6, %vm97_vm5  ;;  %vm3092_vm9 = vcmp.lt.s32.totalorder %v116_v17, 16  ;;  %2173 = vmatpush3.msra.mxu1 %v3132_v44 }
  0x42   :  { %v117_v27 = vsel %vm107_vm8, %v112_v18, %v90_v62  ;;  %2508 = vmatprep.subr.bf16.mxu1 %v2709_v0 }
  0x43   :  { %2129 = vmatmul.mubr.msk.f32.gmra.mrb[4].mxu0 %vm177_vm2, %v394_v58  ;;  %v110_v58 = vadd.s32 18, %v68_v48  ;;  %vm3101_vm10 = vcmp.lt.s32.totalorder %v117_v27, 16 }
  0x44   :  { %2131 = vmatprep.mubr.msk.f32.mxu0 %vm2710_vm0, %v2711_v4  ;;  %2492 = vmatpush3.bf16.msra.mxu0 %v2971_v7 }
  0x45   :  { %2493 = vmatprep.subr.bf16.mxu0 %v2709_v0  ;;  %v115_v5 = vsel %vm3061_vm12, %v110_v58, %v68_v48  ;;  %vm601_vm12 = vcmask 64512   ;;  %v3159_v48 = vsub.s32 0, %v3025_v24 }
  0x46   :  { %vm3083_vm7 = vcmp.lt.s32.totalorder %v115_v5, 16 }
  0x47   :  { %2132 = vmatmul.mubr.msk.f32.gmra.mrb[6].mxu0 %vm177_vm2, %v396_v60 }
  0x48   :  { %2134 = vmatprep.mubr.msk.f32.mxu0 %vm2710_vm0, %v2711_v4  ;;  %2495 = vmatpush3.bf16.msra.mxu0 %v2981_v10 }
  0x49   :  { %2496 = vmatprep.subr.bf16.mxu0 %v2709_v0 }
  0x4b   :  { %2135 = vmatmul.mubr.msk.f32.gmra.mrb[8].mxu0 %vm177_vm2, %v395_v59  ;;  %vm3069_vm2 = vcmp.lt.s32.totalorder %v114_v57, 16 }
  0x4c   :  { %2169 = vmatprep.mubr.msk.f32.mxu0 %vm2710_vm0, %v2711_v4  ;;  %2498 = vmatpush3.bf16.msra.mxu0 %v2991_v13 }
  0x4d   :  { %2499 = vmatprep.subr.bf16.mxu0 %v2709_v0 }
  0x50   :  { %2501 = vmatpush3.bf16.msra.mxu0 %v3001_v16 }
  0x51   :  { %2502 = vmatprep.subr.bf16.mxu0 %v2709_v0 }
  0x54   :  { %2504 = vmatpush3.bf16.msra.mxu0 %v3011_v19 }
  0x55   :  { %2505 = vmatprep.subr.bf16.mxu0 %v2709_v0 }
  0x58   :  { %2507 = vmatpush3.bf16.msra.mxu0 %v3021_v22 }
  0x59   :  { %2604 = vmatprep.subr.bf16.mxu0 %v2709_v0 }
 0x10e   :  { %v3059_v59 = vpop.f32.mrb[0].mxu0 }
 0x10f   :  { %v2124_v61 = vpop.f32.mrb[1].mxu0  ;;  %v512_v9 = vsel %vm3065_vm15, %v3059_v59, 0.0 }
 0x112   :  { %v3075_v8 = vpop.f32.mrb[2].mxu0 }
 0x113   :  { %v513_v11 = vsel %vm3069_vm2, %v3075_v8, 0.0  ;;  %v2127_v12 = vpop.f32.mrb[3].mxu0 }
 0x114   :  { %v517_v14 = vadd.f32 %v513_v11, %v512_v9 }
 0x116   :  { %v3087_v20 = vpop.f32.mrb[4].mxu0 }
 0x117   :  { %v514_v21 = vsel %vm3083_vm7, %v3087_v20, 0.0  ;;  %v2130_v23 = vpop.f32.mrb[5].mxu0 }
 0x118   :  { %v518_v25 = vadd.f32 %v517_v14, %v514_v21 }
 0x11a   :  { %v3096_v28 = vpop.f32.mrb[6].mxu0 }
 0x11b   :  { %v515_v29 = vsel %vm3092_vm9, %v3096_v28, 0.0  ;;  %v2133_v30 = vpop.f32.mrb[7].mxu0 }
 0x11c   :  { %v519_v31 = vadd.f32 %v518_v25, %v515_v29 }
 0x11e   :  { %v3105_v33 = vpop.f32.mrb[8].mxu0 }
 0x11f   :  { %v516_v34 = vsel %vm3101_vm10, %v3105_v33, 0.0  ;;  %v2136_v35 = vpop.f32.mrb[9].mxu0 }
 0x120   :  { %v521_v36 = vsel %vm520_vm11, %v516_v34, 0.0 }
 0x121   :  { %v522_v37 = vadd.f32 %v521_v36, %v519_v31 }
 0x123   :  { %v523_v38 = vrot.slane %v522_v37, 4 }
 0x125   :  { %v524_v39 = vadd.f32 %v523_v38, %v522_v37  ;;  %v776_v38 = vld [vmem:[%s3586_s3] sm:$0x1] }
 0x127   :  { %v525_v40 = vrot.slane %v524_v39, 2 }
 0x129   :  { %v526_v41 = vadd.f32 %v525_v40, %v524_v39 }
 0x12b   :  { %v527_v42 = vrot.slane %v526_v41, 1 }
 0x12d   :  { %v528_v43 = vadd.f32 %v527_v42, %v526_v41  ;;  %v1821_v41 = vld [vmem:[%s3587_s2 + $0x80] sm:$0xff]  ;;  %v1822_v42 = vld [vmem:[%s3587_s2 + $0x88] sm:$0xff] }
 0x12f   :  { %2170 = vmatmul.mubr.f32.vlgmr.msra.gmra.mrb[10].mxu0 %v528_v43  ;;  %v780_v43 = vld [vmem:[%s3588_s4] sm:$0x1] }
 0x130   :  { %2606 = vmatpush3.bf16.msra.mxu0 %v2951_v63  ;;  %2395 = vmatprep.mubr.msk.f32.mxu0 %vm2710_vm0, %v2711_v4 }
 0x131   :  { %2607 = vmatprep.subr.bf16.mxu0 %v2709_v0 }
 0x134   :  { %2609 = vmatpush3.bf16.msra.mxu0 %v2961_v3 }
 0x135   :  { %2610 = vmatprep.subr.bf16.mxu0 %v2709_v0 }
 0x138   :  { %2612 = vmatpush3.bf16.msra.mxu0 %v2971_v7 }
 0x139   :  { %2613 = vmatprep.subr.bf16.mxu0 %v2709_v0 }
 0x13c   :  { %2615 = vmatpush3.bf16.msra.mxu0 %v2981_v10 }
 0x13d   :  { %2616 = vmatprep.subr.bf16.mxu0 %v2709_v0 }
 0x140   :  { %2618 = vmatpush3.bf16.msra.mxu0 %v2991_v13 }
 0x141   :  { %2619 = vmatprep.subr.bf16.mxu0 %v2709_v0 }
 0x144   :  { %2621 = vmatpush3.bf16.msra.mxu0 %v3001_v16 }
 0x145   :  { %2622 = vmatprep.subr.bf16.mxu0 %v2709_v0 }
 0x148   :  { %2624 = vmatpush3.bf16.msra.mxu0 %v3011_v19 }
 0x149   :  { %2625 = vmatprep.subr.bf16.mxu0 %v2709_v0 }
 0x14c   :  { %2627 = vmatpush3.bf16.msra.mxu0 %v3021_v22 }
 0x14d   :  { %2628 = vmatprep.subr.bf16.mxu0 %v2709_v0 }
 0x202   :  { %v595_v45 = vpop.f32.mrb[10].mxu0 }
 0x203   :  { %v3136_v46 = vmul.f32 0.001953125, %v595_v45  ;;  %v2171_v47 = vpop.f32.mrb[11].mxu0 }
 0x204   :  { %v2533_v47 = vpack.c.bf16 %v1822_v42, %v1821_v41 }
 0x205   :  { %2175 = vmatmul.mubr.msk.f32.vlgmr.msra.gmra.mrb[0].mxu1 %vm601_vm12, %v3136_v46 }
 0x206   :  { %2510 = vmatpush3.bf16.msra.mxu1 %v2951_v63  ;;  %2209 = vmatprep.mubr.msk.f32.mxu1 %vm2710_vm0, %v2711_v4 }
 0x207   :  { %2511 = vmatprep.subr.bf16.mxu1 %v2709_v0 }
 0x20a   :  { %2513 = vmatpush3.bf16.msra.mxu1 %v2961_v3 }
 0x20b   :  { %2514 = vmatprep.subr.bf16.mxu1 %v2709_v0 }
 0x20e   :  { %2516 = vmatpush3.bf16.msra.mxu1 %v2971_v7 }
 0x20f   :  { %2517 = vmatprep.subr.bf16.mxu1 %v2709_v0 }
 0x212   :  { %2519 = vmatpush3.bf16.msra.mxu1 %v2981_v10 }
 0x213   :  { %2520 = vmatprep.subr.bf16.mxu1 %v2709_v0 }
 0x216   :  { %2522 = vmatpush3.bf16.msra.mxu1 %v2991_v13 }
 0x217   :  { %2523 = vmatprep.subr.bf16.mxu1 %v2709_v0 }
 0x21a   :  { %2525 = vmatpush3.bf16.msra.mxu1 %v3001_v16 }
 0x21b   :  { %2526 = vmatprep.subr.bf16.mxu1 %v2709_v0 }
 0x21e   :  { %2528 = vmatpush3.bf16.msra.mxu1 %v3011_v19 }
 0x21f   :  { %2529 = vmatprep.subr.bf16.mxu1 %v2709_v0 }
 0x222   :  { %2531 = vmatpush3.bf16.msra.mxu1 %v3021_v22 }
 0x223   :  { %2212 = vmatprep.subr.mxu1 %v2711_v4 }
 0x2d8   :  { %v671_v49 = vpop.f32.mrb[0].mxu1 }
 0x2d9   :  { %v678_v50 = vrot.slane %v671_v49, %v3159_v48  ;;  %v2176_v51 = vpop.f32.mrb[1].mxu1 }
 0x2da   :  { %v1824_v51 = vld [vmem:[%s3587_s2 + $0x98] sm:$0xff] }
 0x2db   :  { %v679_v52 = vsub.f32 %v3059_v59, %v678_v50  ;;  %v680_v53 = vsub.f32 %v3075_v8, %v678_v50  ;;  %v681_v54 = vsub.f32 %v3087_v20, %v678_v50  ;;  %v682_v55 = vsub.f32 %v3096_v28, %v678_v50 }
 0x2dc   :  { %v683_v56 = vsub.f32 %v3105_v33, %v678_v50  ;;  %v1823_v50 = vld [vmem:[%s3587_s2 + $0x90] sm:$0xff] }
 0x2dd   :  { %v684_v57 = vsel %vm3065_vm15, %v679_v52, 0.0  ;;  %v685_v24 = vsel %vm3069_vm2, %v680_v53, 0.0  ;;  %v686_v58 = vsel %vm3083_vm7, %v681_v54, 0.0  ;;  %v687_v5 = vsel %vm3092_vm9, %v682_v55, 0.0  ;;  %v1825_v52 = vld [vmem:[%s3587_s2 + $0xa0] sm:$0xff]  ;;  %v1826_v53 = vld [vmem:[%s3587_s2 + $0xa8] sm:$0xff] }
 0x2de   :  { %v688_v60 = vsel %vm3101_vm10, %v683_v56, 0.0  ;;  %v689_v61 = vmul.f32 %v684_v57, %v684_v57  ;;  %v690_v62 = vmul.f32 %v685_v24, %v685_v24  ;;  %v691_v6 = vmul.f32 %v686_v58, %v686_v58  ;;  %v1827_v55 = vld [vmem:[%s3587_s2 + $0xb0] sm:$0xff]  ;;  %v1828_v56 = vld [vmem:[%s3587_s2 + $0xb8] sm:$0xff]  ;;  %v1829_v24 = vld [vmem:[%s3587_s2 + $0xc0] sm:$0xff] }
 0x2df   :  { %v693_v11 = vmul.f32 %v688_v60, %v688_v60  ;;  %v692_v12 = vmul.f32 %v687_v5, %v687_v5  ;;  %v2539_v54 = vpack.c.bf16 %v1826_v53, %v1825_v52  ;;  %v2542_v57 = vpack.c.bf16 %v1828_v56, %v1827_v55  ;;  %v1830_v58 = vld [vmem:[%s3587_s2 + $0xc8] sm:$0xff] }
 0x2e0   :  { %v694_v9 = vadd.f32 %v690_v62, %v689_v61  ;;  %v2545_v60 = vpack.c.bf16 %v1830_v58, %v1829_v24  ;;  %v1831_v61 = vld [vmem:[%s3587_s2 + $0xd0] sm:$0xff]  ;;  %v1832_v62 = vld [vmem:[%s3587_s2 + $0xd8] sm:$0xff] }
 0x2e1   :  { %v697_v18 = vsel %vm520_vm11, %v693_v11, 0.0  ;;  %v2548_v5 = vpack.c.bf16 %v1832_v62, %v1831_v61 }
 0x2e2   :  { %v695_v14 = vadd.f32 %v694_v9, %v691_v6  ;;  %v1833_v6 = vld [vmem:[%s3587_s2 + $0xe0] sm:$0xff]  ;;  %v1834_v9 = vld [vmem:[%s3587_s2 + $0xe8] sm:$0xff] }
 0x2e3   :  { %v2551_v11 = vpack.c.bf16 %v1834_v9, %v1833_v6  ;;  %v982_v6 = vld [vmem:[%s3587_s2 + $0x10] sm:$0xff]  ;;  %v983_v9 = vld [vmem:[%s3587_s2 + $0x18] sm:$0xff] }
 0x2e4   :  { %v696_v17 = vadd.f32 %v695_v14, %v692_v12  ;;  %v1835_v12 = vld [vmem:[%s3587_s2 + $0xf0] sm:$0xff]  ;;  %v1836_v14 = vld [vmem:[%s3587_s2 + $0xf8] sm:$0xff] }
 0x2e6   :  { %v698_v21 = vadd.f32 %v697_v18, %v696_v17  ;;  %v2554_v17 = vpack.c.bf16 %v1836_v14, %v1835_v12 }
 0x2e8   :  { %v699_v23 = vrot.slane %v698_v21, 4 }
 0x2ea   :  { %v700_v25 = vadd.f32 %v699_v23, %v698_v21 }
 0x2ec   :  { %v701_v27 = vrot.slane %v700_v25, 2 }
 0x2ee   :  { %v702_v29 = vadd.f32 %v701_v27, %v700_v25 }
 0x2f0   :  { %v703_v30 = vrot.slane %v702_v29, 1 }
 0x2f2   :  { %v704_v31 = vadd.f32 %v703_v30, %v702_v29 }
 0x2f4   :  { %2210 = vmatmul.mubr.f32.vlgmr.msra.gmra.mrb[2].mxu1 %v704_v31 }
 0x2f5   :  { %2213 = vmatpush3.msra.mxu1 %v3132_v44  ;;  %2214 = vmatprep.mubr.msk.f32.mxu1 %vm2710_vm0, %v2711_v4 }
 0x2f6   :  { %2217 = vmatprep.subr.mxu1 %v2711_v4 }
 0x3c7   :  { %v771_v34 = vpop.f32.mrb[2].mxu1 }
 0x3c8   :  { %v775_v35 = vmul.f32 0.001953125, %v771_v34  ;;  %v2211_v36 = vpop.f32.mrb[3].mxu1 }
 0x3ca   :  { %v777_v37 = vadd.f32 1e-05, %v775_v35 }
 0x3cc   :  { %2705 = vrsqrt.f32 %v777_v37 }
 0x3d6   :  { %v2706_v39 = vpop.eup %2705 }
 0x3d7   :  { %v779_v40 = vmul.f32 %v2706_v39, %v776_v38 }
 0x3d9   :  { %2215 = vmatmul.mubr.msk.f32.vlgmr.msra.gmra.mrb[4].mxu1 %vm601_vm12, %v779_v40  ;;  %v781_v45 = vmul.f32 %v779_v40, %v3136_v46  ;;  %v2536_v46 = vpack.c.bf16 %v1824_v51, %v1823_v50 }
 0x3da   :  { %2218 = vmatpush3.msra.mxu1 %v3132_v44  ;;  %2219 = vmatprep.mubr.msk.f32.mxu1 %vm2710_vm0, %v2711_v4 }
 0x3db   :  { %v782_v49 = vsub.f32 %v780_v43, %v781_v45  ;;  %2532 = vmatprep.subr.bf16.mxu1 %v2709_v0 }
 0x3dd   :  { %2220 = vmatmul.mubr.msk.f32.vlgmr.msra.gmra.mrb[6].mxu1 %vm601_vm12, %v782_v49 }
 0x3de   :  { %2534 = vmatpush3.bf16.msra.mxu1 %v2533_v47  ;;  %2254 = vmatprep.mubr.msk.f32.mxu1 %vm2710_vm0, %v2711_v4 }
 0x3df   :  { %2535 = vmatprep.subr.bf16.mxu1 %v2709_v0 }
 0x3e2   :  { %2537 = vmatpush3.bf16.msra.mxu1 %v2536_v46 }
 0x3e3   :  { %2538 = vmatprep.subr.bf16.mxu1 %v2709_v0 }
 0x3e6   :  { %2540 = vmatpush3.bf16.msra.mxu1 %v2539_v54 }
 0x3e7   :  { %2541 = vmatprep.subr.bf16.mxu1 %v2709_v0 }
 0x3ea   :  { %2543 = vmatpush3.bf16.msra.mxu1 %v2542_v57 }
 0x3eb   :  { %2544 = vmatprep.subr.bf16.mxu1 %v2709_v0 }
 0x3ee   :  { %2546 = vmatpush3.bf16.msra.mxu1 %v2545_v60 }
 0x3ef   :  { %2547 = vmatprep.subr.bf16.mxu1 %v2709_v0 }
 0x3f2   :  { %2549 = vmatpush3.bf16.msra.mxu1 %v2548_v5 }
 0x3f3   :  { %2550 = vmatprep.subr.bf16.mxu1 %v2709_v0 }
 0x3f6   :  { %2552 = vmatpush3.bf16.msra.mxu1 %v2551_v11 }
 0x3f7   :  { %2553 = vmatprep.subr.bf16.mxu1 %v2709_v0 }
 0x3fa   :  { %2555 = vmatpush3.bf16.msra.mxu1 %v2554_v17 }
 0x3fb   :  { %2556 = vmatprep.subr.bf16.mxu1 %v2709_v0 }
 0x4ac   :  { %v852_v18 = vpop.f32.mrb[4].mxu1 }
 0x4ad   :  { %v932_v21 = vrot.slane %v852_v18, %v3159_v48  ;;  %v2216_v23 = vpop.f32.mrb[5].mxu1 }
 0x4af   :  { %v933_v25 = vmul.f32 %v932_v21, %v3059_v59  ;;  %v934_v27 = vmul.f32 %v932_v21, %v3075_v8  ;;  %v935_v29 = vmul.f32 %v932_v21, %v3087_v20  ;;  %v936_v30 = vmul.f32 %v932_v21, %v3096_v28  ;;  %v980_v20 = vld [vmem:[%s3587_s2] sm:$0xff]  ;;  %v981_v28 = vld [vmem:[%s3587_s2 + $0x8] sm:$0xff] }
 0x4b0   :  { %v937_v31 = vmul.f32 %v932_v21, %v3105_v33  ;;  %v925_v34 = vpop.f32.mrb[6].mxu1  ;;  %v2557_v54 = vpack.c.bf16 %v981_v28, %v980_v20  ;;  %v989_v20 = vld [vmem:[%s3587_s2 + $0x48] sm:$0xff] }
 0x4b1   :  { %v941_v35 = vrot.slane %v925_v34, %v3159_v48  ;;  %v2221_v36 = vpop.f32.mrb[7].mxu1 }
 0x4b2   :  { %v984_v36 = vld [vmem:[%s3587_s2 + $0x20] sm:$0xff] }
 0x4b3   :  { %v942_v37 = vadd.f32 %v941_v35, %v933_v25  ;;  %v943_v38 = vadd.f32 %v941_v35, %v934_v27  ;;  %v944_v39 = vadd.f32 %v941_v35, %v935_v29  ;;  %v945_v40 = vadd.f32 %v941_v35, %v936_v30 }
 0x4b4   :  { %v946_v41 = vadd.f32 %v941_v35, %v937_v31  ;;  %v2560_v31 = vpack.c.bf16 %v983_v9, %v982_v6  ;;  %v1844_v9 = vld [vmem:[%s3587_s2 + $0x120] sm:$0xff] }
 0x4b5   :  { %v947_v42 = vmax.f32 %v942_v37, 0.0  ;;  %v948_v43 = vmax.f32 %v943_v38, 0.0  ;;  %v949_v59 = vmax.f32 %v944_v39, 0.0  ;;  %v950_v45 = vmax.f32 %v945_v40, 0.0  ;;  %v985_v37 = vld [vmem:[%s3587_s2 + $0x28] sm:$0xff] }
 0x4b6   :  { %v951_v8 = vmax.f32 %v946_v41, 0.0 }
 0x4b7   :  { %v952_v33 = vsel %vm3065_vm15, %v947_v42, 0.0  ;;  %v953_v47 = vsel %vm3069_vm2, %v948_v43, 0.0  ;;  %v954_v49 = vsel %vm3083_vm7, %v949_v59, 0.0  ;;  %v955_v50 = vsel %vm3092_vm9, %v950_v45, 0.0  ;;  %v986_v43 = vld [vmem:[%s3587_s2 + $0x30] sm:$0xff]  ;;  %v987_v59 = vld [vmem:[%s3587_s2 + $0x38] sm:$0xff] }
 0x4b8   :  { %v3274_v51 = vrot.slane %v952_v33, 7  ;;  %v964_v46 = vrot.slane %v953_v47, 7  ;;  %v966_v52 = vrot.slane %v954_v49, 7  ;;  %v968_v53 = vrot.slane %v955_v50, 7  ;;  %v990_v33 = vld [vmem:[%s3587_s2 + $0x50] sm:$0xff]  ;;  %v991_v47 = vld [vmem:[%s3587_s2 + $0x58] sm:$0xff] }
 0x4b9   :  { %v956_v55 = vsel %vm3101_vm10, %v951_v8, 0.0  ;;  %v2563_v42 = vpack.c.bf16 %v985_v37, %v984_v36  ;;  %v2566_v45 = vpack.c.bf16 %v987_v59, %v986_v43  ;;  %v988_v8 = vld [vmem:[%s3587_s2 + $0x40] sm:$0xff]  ;;  %v2572_v49 = vpack.c.bf16 %v991_v47, %v990_v33  ;;  %v1855_v37 = vld [vmem:[%s3587_s2 + $0x178] sm:$0xff] }
 0x4ba   :  { %v3280_v56 = vsel %vm962_vm13, %v3274_v51, %v964_v46  ;;  %v977_v57 = vsel %vm962_vm13, 0.0, %v3274_v51  ;;  %v3285_v24 = vsel %vm962_vm13, %v964_v46, %v966_v52  ;;  %v3288_v58 = vsel %vm962_vm13, %v966_v52, %v968_v53  ;;  %v992_v50 = vld [vmem:[%s3587_s2 + $0x60] sm:$0xff]  ;;  %v993_v46 = vld [vmem:[%s3587_s2 + $0x68] sm:$0xff] }
 0x4bb   :  { %v1015_v60 = vrot.slane %v977_v57, 1  ;;  %v1016_v61 = vrot.slane %v3280_v56, 1  ;;  %v1226_v62 = vrot.slane %v977_v57, 2  ;;  %v1018_v5 = vrot.slane %v3285_v24, 1  ;;  %v1840_v57 = vld [vmem:[%s3587_s2 + $0x100] sm:$0xff] }
 0x4bc   :  { %v1020_v11 = vrot.slane %v3288_v58, 1  ;;  %v970_v12 = vrot.slane %v956_v55, 7  ;;  %v1227_v14 = vrot.slane %v3280_v56, 2  ;;  %v1229_v17 = vrot.slane %v3285_v24, 2 }
 0x4bd   :  { %v1017_v18 = vsel %vm167_vm1, %v1015_v60, %v1016_v61  ;;  %v1019_v21 = vsel %vm167_vm1, %v1016_v61, %v1018_v5  ;;  %v1231_v23 = vrot.slane %v3288_v58, 2  ;;  %v2569_v28 = vpack.c.bf16 %v989_v20, %v988_v8  ;;  %v1841_v60 = vld [vmem:[%s3587_s2 + $0x108] sm:$0xff] }
 0x4be   :  { %2255 = vmatmul.mubr.f32.vlgmr.msra.gmra.mrb[8].mxu1 %v1017_v18  ;;  %v1021_v25 = vsel %vm167_vm1, %v1018_v5, %v1020_v11  ;;  %v3306_v27 = vsel %vm962_vm13, %v968_v53, %v970_v12  ;;  %v3309_v29 = vsel %vm387_vm3, %v1226_v62, %v1227_v14  ;;  %v3312_v30 = vsel %vm387_vm3, %v1227_v14, %v1229_v17  ;;  %v994_v53 = vld [vmem:[%s3587_s2 + $0x70] sm:$0xff]  ;;  %v1843_v5 = vld [vmem:[%s3587_s2 + $0x118] sm:$0xff]  ;;  %v1849_v18 = vld [vmem:[%s3587_s2 + $0x148] sm:$0xff] }
 0x4bf   :  { %2558 = vmatpush3.bf16.msra.mxu1 %v2557_v54  ;;  %2257 = vmatprep.mubr.msk.f32.mxu1 %vm2710_vm0, %v2711_v4  ;;  %v3318_v34 = vsel %vm978_vm14, %v3306_v27, 0.0  ;;  %v3321_v35 = vsel %vm387_vm3, %v1229_v17, %v1231_v23  ;;  %v2575_v52 = vpack.c.bf16 %v993_v46, %v992_v50  ;;  %v995_v54 = vld [vmem:[%s3587_s2 + $0x78] sm:$0xff]  ;;  %v2581_v61 = vpack.c.bf16 %v1841_v60, %v1840_v57  ;;  %v1842_v62 = vld [vmem:[%s3587_s2 + $0x110] sm:$0xff]  ;;  %v1848_v17 = vld [vmem:[%s3587_s2 + $0x140] sm:$0xff] }
 0x4c0   :  { %2559 = vmatprep.subr.bf16.mxu1 %v2709_v0  ;;  %v1022_v38 = vrot.slane %v3318_v34, 1  ;;  %v1233_v39 = vrot.slane %v3318_v34, 2  ;;  %v2578_v55 = vpack.c.bf16 %v995_v54, %v994_v53  ;;  %v2584_v6 = vpack.c.bf16 %v1843_v5, %v1842_v62  ;;  %v1846_v12 = vld [vmem:[%s3587_s2 + $0x130] sm:$0xff]  ;;  %v1847_v14 = vld [vmem:[%s3587_s2 + $0x138] sm:$0xff] }
 0x4c2   :  { %2258 = vmatmul.mubr.f32.gmra.mrb[10].mxu1 %v1019_v21  ;;  %v1023_v40 = vsel %vm167_vm1, %v1020_v11, %v1022_v38  ;;  %v3336_v41 = vsel %vm387_vm3, %v1231_v23, %v1233_v39  ;;  %vm1837_vm1 = vmneg %vm962_vm13  ;;  %v1845_v11 = vld [vmem:[%s3587_s2 + $0x128] sm:$0xff]  ;;  %v1850_v21 = vld [vmem:[%s3587_s2 + $0x150] sm:$0xff] }
 0x4c3   :  { %2561 = vmatpush3.bf16.msra.mxu1 %v2560_v31  ;;  %2260 = vmatprep.mubr.msk.f32.mxu1 %vm2710_vm0, %v2711_v4  ;;  %v1851_v23 = vld [vmem:[%s3587_s2 + $0x158] sm:$0xff]  ;;  %v1853_v31 = vld [vmem:[%s3587_s2 + $0x168] sm:$0xff] }
 0x4c4   :  { %2562 = vmatprep.subr.bf16.mxu1 %v2709_v0 }
 0x4c6   :  { %2261 = vmatmul.mubr.f32.gmra.mrb[12].mxu1 %v1021_v25  ;;  %v1852_v25 = vld [vmem:[%s3587_s2 + $0x160] sm:$0xff] }
 0x4c7   :  { %2564 = vmatpush3.bf16.msra.mxu1 %v2563_v42  ;;  %2263 = vmatprep.mubr.msk.f32.mxu1 %vm2710_vm0, %v2711_v4  ;;  %v2599_v36 = vpack.c.bf16 %v1853_v31, %v1852_v25 }
 0x4c8   :  { %2565 = vmatprep.subr.bf16.mxu1 %v2709_v0 }
 0x4ca   :  { %2264 = vmatmul.mubr.f32.gmra.mrb[14].mxu1 %v1023_v40 }
 0x4cb   :  { %2567 = vmatpush3.bf16.msra.mxu1 %v2566_v45  ;;  %2266 = vmatprep.mubr.msk.f32.mxu1 %vm2710_vm0, %v2711_v4 }
 0x4cc   :  { %2568 = vmatprep.subr.bf16.mxu1 %v2709_v0 }
 0x4ce   :  { %2267 = vmatmul.mubr.f32.gmra.mrb[16].mxu1 %v1022_v38 }
 0x4cf   :  { %2570 = vmatpush3.bf16.msra.mxu1 %v2569_v28  ;;  %2301 = vmatprep.mubr.msk.f32.mxu1 %vm2710_vm0, %v2711_v4 }
 0x4d0   :  { %2571 = vmatprep.subr.bf16.mxu1 %v2709_v0 }
 0x4d3   :  { %2573 = vmatpush3.bf16.msra.mxu1 %v2572_v49 }
 0x4d4   :  { %2574 = vmatprep.subr.bf16.mxu1 %v2709_v0 }
 0x4d7   :  { %2576 = vmatpush3.bf16.msra.mxu1 %v2575_v52 }
 0x4d8   :  { %2577 = vmatprep.subr.bf16.mxu1 %v2709_v0 }
 0x4db   :  { %2579 = vmatpush3.bf16.msra.mxu1 %v2578_v55 }
 0x4dc   :  { %2580 = vmatprep.subr.bf16.mxu1 %v2709_v0 }
 0x4de   :  { %2302 = vmatmul.mubr.msk.f32.vlgmr.msra.gmra.mrb[8].mxu1 %vm1837_vm1, %v3274_v51  ;;  %v2587_v51 = vpack.c.bf16 %v1845_v11, %v1844_v9 }
 0x4df   :  { %2582 = vmatpush3.bf16.msra.mxu1 %v2581_v61  ;;  %2304 = vmatprep.mubr.msk.f32.mxu1 %vm2710_vm0, %v2711_v4 }
 0x4e0   :  { %2583 = vmatprep.subr.bf16.mxu1 %v2709_v0 }
 0x4e2   :  { %2305 = vmatmul.mubr.f32.gmra.mrb[10].mxu1 %v3280_v56  ;;  %v2590_v56 = vpack.c.bf16 %v1847_v14, %v1846_v12 }
 0x4e3   :  { %2585 = vmatpush3.bf16.msra.mxu1 %v2584_v6  ;;  %2307 = vmatprep.mubr.msk.f32.mxu1 %vm2710_vm0, %v2711_v4 }
 0x4e4   :  { %2586 = vmatprep.subr.bf16.mxu1 %v2709_v0 }
 0x4e6   :  { %2308 = vmatmul.mubr.f32.gmra.mrb[12].mxu1 %v3285_v24  ;;  %v2593_v24 = vpack.c.bf16 %v1849_v18, %v1848_v17 }
 0x4e7   :  { %2588 = vmatpush3.bf16.msra.mxu1 %v2587_v51  ;;  %2310 = vmatprep.mubr.msk.f32.mxu1 %vm2710_vm0, %v2711_v4 }
 0x4e8   :  { %2589 = vmatprep.subr.bf16.mxu1 %v2709_v0 }
 0x4ea   :  { %2311 = vmatmul.mubr.f32.gmra.mrb[14].mxu1 %v3288_v58  ;;  %v2596_v58 = vpack.c.bf16 %v1851_v23, %v1850_v21 }
 0x4eb   :  { %2591 = vmatpush3.bf16.msra.mxu1 %v2590_v56  ;;  %2313 = vmatprep.mubr.msk.f32.mxu1 %vm2710_vm0, %v2711_v4 }
 0x4ec   :  { %2592 = vmatprep.subr.bf16.mxu1 %v2709_v0 }
 0x4ee   :  { %2314 = vmatmul.mubr.msk.f32.gmra.mrb[16].mxu1 %vm978_vm14, %v3306_v27  ;;  %v1854_v27 = vld [vmem:[%s3587_s2 + $0x170] sm:$0xff] }
 0x4ef   :  { %2594 = vmatpush3.bf16.msra.mxu1 %v2593_v24  ;;  %2348 = vmatprep.mubr.msk.f32.mxu1 %vm2710_vm0, %v2711_v4  ;;  %v2602_v38 = vpack.c.bf16 %v1855_v37, %v1854_v27 }
 0x4f0   :  { %2595 = vmatprep.subr.bf16.mxu1 %v2709_v0 }
 0x4f3   :  { %2597 = vmatpush3.bf16.msra.mxu1 %v2596_v58 }
 0x4f4   :  { %2598 = vmatprep.subr.bf16.mxu1 %v2709_v0 }
 0x4f7   :  { %2600 = vmatpush3.bf16.msra.mxu1 %v2599_v36 }
 0x4f8   :  { %2601 = vmatprep.subr.bf16.mxu1 %v2709_v0 }
 0x4fb   :  { %2603 = vmatpush3.bf16.msra.mxu1 %v2602_v38 }
 0x4fc   :  { %2398 = vmatprep.subr.mxu1 %v2711_v4 }
 0x4fe   :  { %2349 = vmatmul.mubr.f32.vlgmr.msra.gmra.mrb[8].mxu1 %v3309_v29 }
 0x4ff   :  { %2351 = vmatprep.mubr.msk.f32.mxu1 %vm2710_vm0, %v2711_v4  ;;  %2399 = vmatpush3.msra.mxu1 %v3132_v44 }
 0x502   :  { %2352 = vmatmul.mubr.f32.gmra.mrb[10].mxu1 %v3312_v30 }
 0x503   :  { %2354 = vmatprep.mubr.msk.f32.mxu1 %vm2710_vm0, %v2711_v4 }
 0x506   :  { %2355 = vmatmul.mubr.f32.gmra.mrb[12].mxu1 %v3321_v35 }
 0x507   :  { %2357 = vmatprep.mubr.msk.f32.mxu1 %vm2710_vm0, %v2711_v4 }
 0x50a   :  { %2358 = vmatmul.mubr.f32.gmra.mrb[14].mxu1 %v3336_v41 }
 0x50b   :  { %2360 = vmatprep.mubr.msk.f32.mxu1 %vm2710_vm0, %v2711_v4 }
 0x50e   :  { %2361 = vmatmul.mubr.f32.gmra.mrb[16].mxu1 %v1233_v39 }
 0x50f   :  { %2400 = vmatprep.mubr.msk.f32.mxu1 %vm2710_vm0, %v2711_v4 }
 0x5d1   :  { %v3473_v29 = vpop.f32.mrb[8].mxu1 }
 0x5d2   :  { %v2350_v30 = vpop.f32.mrb[9].mxu1  ;;  %v1335_v35 = vsel %vm3065_vm15, %v3473_v29, 0.0 }
 0x5d5   :  { %v3475_v40 = vpop.f32.mrb[10].mxu1 }
 0x5d6   :  { %v1336_v41 = vsel %vm3069_vm2, %v3475_v40, 0.0  ;;  %v2353_v42 = vpop.f32.mrb[11].mxu1 }
 0x5d7   :  { %v1340_v43 = vadd.f32 %v1336_v41, %v1335_v35 }
 0x5d9   :  { %v3483_v34 = vpop.f32.mrb[12].mxu1 }
 0x5da   :  { %v1337_v39 = vsel %vm3083_vm7, %v3483_v34, 0.0  ;;  %v2356_v59 = vpop.f32.mrb[13].mxu1 }
 0x5db   :  { %v1341_v45 = vadd.f32 %v1340_v43, %v1337_v39  ;;  %v1596_v59 = vld [vmem:[%s3589_s5] sm:$0x1] }
 0x5dd   :  { %v3488_v8 = vpop.f32.mrb[14].mxu1 }
 0x5de   :  { %v1338_v20 = vsel %vm3092_vm9, %v3488_v8, 0.0  ;;  %v2359_v28 = vpop.f32.mrb[15].mxu1 }
 0x5df   :  { %v1342_v33 = vadd.f32 %v1341_v45, %v1338_v20  ;;  %v1600_v28 = vld [vmem:[%s3590_s6] sm:$0x1] }
 0x5e1   :  { %v3493_v47 = vpop.f32.mrb[16].mxu1 }
 0x5e2   :  { %v1339_v49 = vsel %vm3101_vm10, %v3493_v47, 0.0  ;;  %v2362_v50 = vpop.f32.mrb[17].mxu1 }
 0x5e3   :  { %v1343_v46 = vsel %vm520_vm11, %v1339_v49, 0.0 }
 0x5e4   :  { %v1344_v52 = vadd.f32 %v1343_v46, %v1342_v33 }
 0x5e6   :  { %v1345_v53 = vrot.slane %v1344_v52, 4 }
 0x5e8   :  { %v1346_v54 = vadd.f32 %v1345_v53, %v1344_v52 }
 0x5ea   :  { %v1347_v55 = vrot.slane %v1346_v54, 2 }
 0x5ec   :  { %v1348_v57 = vadd.f32 %v1347_v55, %v1346_v54 }
 0x5ee   :  { %v1349_v60 = vrot.slane %v1348_v57, 1 }
 0x5f0   :  { %v1350_v61 = vadd.f32 %v1349_v60, %v1348_v57 }
 0x5f2   :  { %2396 = vmatmul.mubr.f32.vlgmr.msra.gmra.mrb[12].mxu0 %v1350_v61 }
 0x5f3   :  { %2630 = vmatpush3.bf16.msra.mxu0 %v2951_v63  ;;  %2435 = vmatprep.mubr.msk.f32.mxu0 %vm2710_vm0, %v2711_v4 }
 0x5f4   :  { %2631 = vmatprep.subr.bf16.mxu0 %v2709_v0 }
 0x5f7   :  { %2633 = vmatpush3.bf16.msra.mxu0 %v2961_v3 }
 0x5f8   :  { %2634 = vmatprep.subr.bf16.mxu0 %v2709_v0 }
 0x5fb   :  { %2636 = vmatpush3.bf16.msra.mxu0 %v2971_v7 }
 0x5fc   :  { %2637 = vmatprep.subr.bf16.mxu0 %v2709_v0 }
 0x5ff   :  { %2639 = vmatpush3.bf16.msra.mxu0 %v2981_v10 }
 0x600   :  { %2640 = vmatprep.subr.bf16.mxu0 %v2709_v0 }
 0x603   :  { %2642 = vmatpush3.bf16.msra.mxu0 %v2991_v13 }
 0x604   :  { %2643 = vmatprep.subr.bf16.mxu0 %v2709_v0 }
 0x607   :  { %2645 = vmatpush3.bf16.msra.mxu0 %v3001_v16 }
 0x608   :  { %2646 = vmatprep.subr.bf16.mxu0 %v2709_v0 }
 0x60b   :  { %2648 = vmatpush3.bf16.msra.mxu0 %v3011_v19 }
 0x60c   :  { %2649 = vmatprep.subr.bf16.mxu0 %v2709_v0 }
 0x60f   :  { %2651 = vmatpush3.bf16.msra.mxu0 %v3021_v22 }
 0x610   :  { %2438 = vmatprep.subr.mxu0 %v2711_v4 }
 0x6c5   :  { %v1417_v63 = vpop.f32.mrb[12].mxu0 }
 0x6c6   :  { %v1421_v3 = vmul.f32 0.001953125, %v1417_v63  ;;  %v2397_v7 = vpop.f32.mrb[13].mxu0 }
 0x6c8   :  { %2401 = vmatmul.mubr.msk.f32.vlgmr.msra.gmra.mrb[18].mxu1 %vm601_vm12, %v1421_v3 }
 0x79b   :  { %v1491_v10 = vpop.f32.mrb[18].mxu1 }
 0x79c   :  { %v1498_v13 = vrot.slane %v1491_v10, %v3159_v48  ;;  %v2402_v62 = vpop.f32.mrb[19].mxu1 }
 0x79e   :  { %v1499_v16 = vsub.f32 %v3473_v29, %v1498_v13  ;;  %v1500_v5 = vsub.f32 %v3475_v40, %v1498_v13  ;;  %v1501_v19 = vsub.f32 %v3483_v34, %v1498_v13  ;;  %v1502_v0 = vsub.f32 %v3488_v8, %v1498_v13 }
 0x79f   :  { %v1503_v22 = vsub.f32 %v3493_v47, %v1498_v13 }
 0x7a0   :  { %v1504_v6 = vsel %vm3065_vm15, %v1499_v16, 0.0  ;;  %v1505_v9 = vsel %vm3069_vm2, %v1500_v5, 0.0  ;;  %v1506_v11 = vsel %vm3083_vm7, %v1501_v19, 0.0  ;;  %v1507_v56 = vsel %vm3092_vm9, %v1502_v0, 0.0 }
 0x7a1   :  { %v1508_v51 = vsel %vm3101_vm10, %v1503_v22, 0.0  ;;  %v1509_v12 = vmul.f32 %v1504_v6, %v1504_v6  ;;  %v1510_v14 = vmul.f32 %v1505_v9, %v1505_v9  ;;  %v1511_v17 = vmul.f32 %v1506_v11, %v1506_v11 }
 0x7a2   :  { %v1513_v24 = vmul.f32 %v1508_v51, %v1508_v51  ;;  %v1512_v21 = vmul.f32 %v1507_v56, %v1507_v56 }
 0x7a3   :  { %v1514_v18 = vadd.f32 %v1510_v14, %v1509_v12 }
 0x7a4   :  { %v1517_v25 = vsel %vm520_vm11, %v1513_v24, 0.0 }
 0x7a5   :  { %v1515_v23 = vadd.f32 %v1514_v18, %v1511_v17 }
 0x7a7   :  { %v1516_v58 = vadd.f32 %v1515_v23, %v1512_v21 }
 0x7a9   :  { %v1518_v31 = vadd.f32 %v1517_v25, %v1516_v58 }
 0x7ab   :  { %v1519_v36 = vrot.slane %v1518_v31, 4 }
 0x7ad   :  { %v1520_v27 = vadd.f32 %v1519_v36, %v1518_v31 }
 0x7af   :  { %v1521_v37 = vrot.slane %v1520_v27, 2 }
 0x7b1   :  { %v1522_v38 = vadd.f32 %v1521_v37, %v1520_v27 }
 0x7b3   :  { %v1523_v30 = vrot.slane %v1522_v38, 1 }
 0x7b5   :  { %v1524_v35 = vadd.f32 %v1523_v30, %v1522_v38 }
 0x7b7   :  { %2436 = vmatmul.mubr.f32.vlgmr.msra.gmra.mrb[14].mxu0 %v1524_v35 }
 0x7b8   :  { %2439 = vmatpush3.msra.mxu0 %v3132_v44  ;;  %2440 = vmatprep.mubr.msk.f32.mxu0 %vm2710_vm0, %v2711_v4 }
 0x7b9   :  { %2443 = vmatprep.subr.mxu0 %v2711_v4 }
 0x88a   :  { %v1591_v41 = vpop.f32.mrb[14].mxu0 }
 0x88b   :  { %v1595_v42 = vmul.f32 0.001953125, %v1591_v41  ;;  %v2437_v43 = vpop.f32.mrb[15].mxu0 }
 0x88d   :  { %v1597_v39 = vadd.f32 1e-05, %v1595_v42 }
 0x88f   :  { %2707 = vrsqrt.f32 %v1597_v39 }
 0x899   :  { %v2708_v45 = vpop.eup %2707 }
 0x89a   :  { %v1599_v20 = vmul.f32 %v2708_v45, %v1596_v59 }
 0x89c   :  { %2441 = vmatmul.mubr.msk.f32.vlgmr.msra.gmra.mrb[16].mxu0 %vm601_vm12, %v1599_v20  ;;  %v1601_v33 = vmul.f32 %v1599_v20, %v1421_v3 }
 0x89d   :  { %2444 = vmatpush3.msra.mxu0 %v3132_v44  ;;  %2445 = vmatprep.mubr.msk.f32.mxu0 %vm2710_vm0, %v2711_v4 }
 0x89e   :  { %v1602_v49 = vsub.f32 %v1600_v28, %v1601_v33 }
 0x8a0   :  { %2446 = vmatmul.mubr.msk.f32.vlgmr.msra.gmra.mrb[18].mxu0 %vm601_vm12, %v1602_v49 }
 0x96f   :  { %v1672_v50 = vpop.f32.mrb[16].mxu0 }
 0x970   :  { %v1752_v46 = vrot.slane %v1672_v50, %v3159_v48  ;;  %v2442_v52 = vpop.f32.mrb[17].mxu0 }
 0x972   :  { %v1753_v53 = vmul.f32 %v1752_v46, %v3473_v29  ;;  %v1754_v54 = vmul.f32 %v1752_v46, %v3475_v40  ;;  %v1755_v55 = vmul.f32 %v1752_v46, %v3483_v34  ;;  %v1756_v57 = vmul.f32 %v1752_v46, %v3488_v8 }
 0x973   :  { %v1757_v44 = vmul.f32 %v1752_v46, %v3493_v47  ;;  %v1745_v60 = vpop.f32.mrb[18].mxu0 }
 0x974   :  { %v1761_v4 = vrot.slane %v1745_v60, %v3159_v48  ;;  %v2447_v61 = vpop.f32.mrb[19].mxu0 }
 0x976   :  { %v1762_v63 = vadd.f32 %v1761_v4, %v1753_v53  ;;  %v1763_v3 = vadd.f32 %v1761_v4, %v1754_v54  ;;  %v1764_v7 = vadd.f32 %v1761_v4, %v1755_v55  ;;  %v1765_v10 = vadd.f32 %v1761_v4, %v1756_v57 }
 0x977   :  { %v1766_v13 = vadd.f32 %v1761_v4, %v1757_v44 }
 0x978   :  { %v1767_v62 = vmax.f32 %v1762_v63, 0.0  ;;  %v1768_v16 = vmax.f32 %v1763_v3, 0.0  ;;  %v1769_v29 = vmax.f32 %v1764_v7, 0.0  ;;  %v1770_v5 = vmax.f32 %v1765_v10, 0.0 }
 0x979   :  { %v1771_v40 = vmax.f32 %v1766_v13, 0.0 }
 0x97a   :  { %v1772_v34 = vsel %vm3065_vm15, %v1767_v62, 0.0  ;;  %v1773_v8 = vsel %vm3069_vm2, %v1768_v16, 0.0  ;;  %v1774_v48 = vsel %vm3083_vm7, %v1769_v29, 0.0  ;;  %v1775_v47 = vsel %vm3092_vm9, %v1770_v5, 0.0 }
 0x97b   :  { %v1776_v19 = vsel %vm3101_vm10, %v1771_v40, 0.0  ;;  %1777 = vst [vmem:[%s3591_s9] sm:$0xff] %v1772_v34  ;;  %1778 = vst [vmem:[%s3591_s9 + $0x8] sm:$0xff] %v1773_v8 }
 0x97c   :  { %1859 = vst [vmem:[%s3591_s9 + $0xe] sm:$0xfc] %v1774_v48  ;;  %1860 = vst [vmem:[%s3591_s9 + $0x16] sm:$0xff] %v1775_v47 }
 0x97d   :  { %1861 = vst [vmem:[%s3591_s9 + $0x1e] sm:$0x3] %v1776_v19 }

</bundles_post_ra>
